<compile_context>
chip_gen: v5e
topology: v5e:2x2
jax: 0.10.0
libtpu: 0.0.40
codegen_flags: <defaults>
</compile_context>

<pallas_src>
import functools

import jax
import jax.numpy as jnp
from jax.experimental import pallas as pl
from jax.experimental.pallas import tpu as pltpu

EPS = 1e-5


# ----------------------------- in-kernel helpers ------------------------------


def _emit_stats(st_ref, p):
    """Write per-tile BN partials [sum, sum_sq] over the lane (spatial) axis.

    p: (C, L) float32 (the f32 accumulator, *not* the bf16-rounded store).
    st_ref block shape: (1, 1, C, 2).
    """
    c = p.shape[0]
    st_ref[0:1, 0:1, :, 0:1] = jnp.sum(p, axis=-1, keepdims=True).reshape(1, 1, c, 1)
    st_ref[0:1, 0:1, :, 1:2] = jnp.sum(p * p, axis=-1, keepdims=True).reshape(1, 1, c, 1)


# ------------------------------- kernels --------------------------------------


def expand_kernel(x_ref, w1_ref, o1_ref, st1_ref):
    """1x1 expand conv (pre-BN): bf16 MXU matmul, f32 acc; emits BN1 partials."""
    x = x_ref[0].astype(jnp.bfloat16)                          # (Cin, t_hw)
    pre = jnp.dot(w1_ref[...], x, preferred_element_type=jnp.float32)  # (Cexp, t_hw)
    o1_ref[0] = pre.astype(jnp.bfloat16)
    _emit_stats(st1_ref, pre)


def expand_res_kernel(x_ref, w1_ref, wr_ref, o1_ref, or_ref, st1_ref, str_ref):
    """Fused expand conv + residual 1x1 conv: x is streamed from HBM once."""
    x = x_ref[0].astype(jnp.bfloat16)                          # (Cin, t_hw)
    pre = jnp.dot(w1_ref[...], x, preferred_element_type=jnp.float32)
    o1_ref[0] = pre.astype(jnp.bfloat16)
    _emit_stats(st1_ref, pre)

    res = jnp.dot(wr_ref[...], x, preferred_element_type=jnp.float32)
    or_ref[0] = res.astype(jnp.bfloat16)
    _emit_stats(str_ref, res)


def depthwise_kernel(h1_ref, wdw_ref, sc1_ref, sh1_ref, mask_ref, o_ref, st_ref,
                     *, width):
    """BN1 + ReLU6 fused with the 3x3 depthwise conv (stride 1, zero padding).

    Block layout: channels on sublanes, flattened H*W on lanes.  The 8 non-center
    taps are lane-axis rolls of the activated block combined with precomputed
    0/1 boundary masks (no halo scratch to zero, no misaligned slices).
    """
    hw = h1_ref.shape[-1]
    a = h1_ref[0].astype(jnp.float32)                          # (tc, HW)
    a = jnp.clip(a * sc1_ref[...] + sh1_ref[...], 0.0, 6.0)
    w = wdw_ref[...].astype(jnp.float32)                       # (tc, 9)

    # 0/1 masks, each (1, HW): [col > 0, col < W-1, row > 0, row < H-1]
    m_cl = mask_ref[0:1, :]
    m_cr = mask_ref[1:2, :]
    m_ru = mask_ref[2:3, :]
    m_rd = mask_ref[3:4, :]
    row_mask = (m_ru, None, m_rd)
    col_mask = (m_cl, None, m_cr)

    acc = a * w[:, 4:5]                                        # center tap (ki=kj=1)
    for ki in range(3):
        for kj in range(3):
            if ki == 1 and kj == 1:
                continue
            off = (ki - 1) * width + (kj - 1)                  # flattened source offset
            src = pltpu.roll(a, (-off) % hw, axis=1)           # src[p] == a[p + off]
            mr, mc = row_mask[ki], col_mask[kj]
            m = mr if mc is None else (mc if mr is None else mr * mc)
            k = ki * 3 + kj
            acc = acc + (src * m) * w[:, k:k + 1]

    o_ref[0] = acc.astype(jnp.bfloat16)
    _emit_stats(st_ref, acc)


def project_kernel(h2_ref, sc2_ref, sh2_ref, w2_ref, o_ref, st_ref):
    """BN2 + ReLU6 fused with the 1x1 projection conv; emits BN3 partials."""
    h = h2_ref[0].astype(jnp.float32)                          # (Cexp, t_hw)
    h = jnp.clip(h * sc2_ref[...] + sh2_ref[...], 0.0, 6.0)
    y = jnp.dot(w2_ref[...], h.astype(jnp.bfloat16),
                preferred_element_type=jnp.float32)            # (Cout, t_hw)
    o_ref[0] = y.astype(jnp.bfloat16)
    _emit_stats(st_ref, y)


def finalize_res_kernel(y_ref, sc3_ref, sh3_ref, r_ref, scr_ref, shr_ref, o_ref):
    """BN3 on the projection + BN on the res_conv branch, fused add (f32 out)."""
    y = y_ref[0].astype(jnp.float32) * sc3_ref[...] + sh3_ref[...]
    r = r_ref[0].astype(jnp.float32) * scr_ref[...] + shr_ref[...]
    o_ref[0] = y + r


def finalize_id_kernel(y_ref, sc3_ref, sh3_ref, x_ref, o_ref):
    """BN3 on the projection + identity residual (exact f32 x, no layout change)."""
    y = y_ref[0].astype(jnp.float32) * sc3_ref[...] + sh3_ref[...]
    o_ref[0] = y + x_ref[0]


# --------------------------- pallas_call glue ----------------------------------


def _compiler_params():
    return pltpu.CompilerParams(
        dimension_semantics=("parallel", "parallel"),
        vmem_limit_bytes=48 * 1024 * 1024,
    )


def _pick_hw_tile(hw, c_major, n_batch, bytes_target=2 * 1024 * 1024):
    """Spatial (lane) tile: divisor of H*W, multiple of 128, chosen by a byte
    budget while preferring >= 4 total grid steps (megacore + DMA pipelining)."""
    divs = [d for d in range(128, hw + 1, 128) if hw % d == 0]
    if not divs:
        return hw
    best = None
    for d in sorted(divs):
        if c_major * d * 4 <= bytes_target and n_batch * (hw // d) >= 4:
            best = d
    if best is None:
        under = [d for d in divs if c_major * d * 4 <= bytes_target]
        best = max(under) if under else min(divs)
    return best


def _pick_c_tile(c, hw, n_batch, bytes_target=4 * 1024 * 1024):
    """Channel tile for the depthwise pass: divisor of Cexp, multiple of 8,
    sized so the ~4 live f32 working arrays stay within a VMEM/vreg budget."""
    cands = [d for d in range(8, c + 1, 8) if c % d == 0]
    if not cands:
        return c
    best = None
    for d in sorted(cands):
        if 4 * d * hw * 4 <= bytes_target and n_batch * (c // d) >= 4:
            best = d
    if best is None:
        under = [d for d in cands if 4 * d * hw * 4 <= bytes_target]
        best = max(under) if under else min(cands)
    return best


def _bn_affine(tot, count, gamma, beta):
    """Fold training-mode BN (batch mean / biased var, eps=1e-5) into scale+shift.

    tot: (C, 2) summed [sum, sum_sq] partials (f32, tiny XLA reduction).
    """
    mean = tot[:, 0] / count
    var = jnp.maximum(tot[:, 1] / count - mean * mean, 0.0)
    inv = jax.lax.rsqrt(var + EPS)
    scale = gamma * inv
    shift = beta - mean * scale
    return (scale.reshape(-1, 1).astype(jnp.float32),
            shift.reshape(-1, 1).astype(jnp.float32))


# -------------------------------- module ---------------------------------------


def init_params(key, in_channels, out_channels, t):
    """Deterministic synthetic weights matching the PyTorch module's shapes.

    Weights are kept in the torch (out, in) orientation:
      conv1  (Cexp, Cin, 1, 1) -> (Cexp, Cin)
      dwconv (Cexp, 1, 3, 3)   -> (Cexp, 9), tap index k = di*3 + dj
      conv2  (Cout, Cexp, 1, 1)-> (Cout, Cexp)
    """
    cexp = in_channels * t
    k1, k2, k3, k4 = jax.random.split(key, 4)
    params = {
        "w1": jax.random.normal(k1, (cexp, in_channels), jnp.float32) * 0.1,
        "w_dw": jax.random.normal(k2, (cexp, 9), jnp.float32) * 0.1,
        "w2": jax.random.normal(k3, (out_channels, cexp), jnp.float32) * 0.1,
        "g1": jnp.ones((cexp,), jnp.float32), "b1": jnp.zeros((cexp,), jnp.float32),
        "g2": jnp.ones((cexp,), jnp.float32), "b2": jnp.zeros((cexp,), jnp.float32),
        "g3": jnp.ones((out_channels,), jnp.float32),
        "b3": jnp.zeros((out_channels,), jnp.float32),
    }
    if in_channels != out_channels:
        params["w_res"] = (
            jax.random.normal(k4, (out_channels, in_channels), jnp.float32) * 0.1)
        params["gr"] = jnp.ones((out_channels,), jnp.float32)
        params["br"] = jnp.zeros((out_channels,), jnp.float32)
    return params


@functools.partial(jax.jit, static_argnames=("s",))
def inverted_residual(x_nchw, params, s=1):
    if s != 1:
        raise NotImplementedError("only stride 1 is implemented")

    N, Cin, H, W = x_nchw.shape
    Cexp = params["w1"].shape[0]
    Cout = params["w2"].shape[0]
    HW = H * W
    count = float(N * HW)
    has_res = "w_res" in params

    # Free reshape: NCHW stays NCHW, we just flatten the spatial dims onto lanes.
    x = x_nchw.reshape(N, Cin, HW).astype(jnp.float32)

    w1 = params["w1"].astype(jnp.bfloat16)
    w2 = params["w2"].astype(jnp.bfloat16)
    wdw = params["w_dw"].astype(jnp.float32)

    t_hw = _pick_hw_tile(HW, Cexp, N)
    n_hw = HW // t_hw
    tc = _pick_c_tile(Cexp, HW, N)
    n_c = Cexp // tc
    cp = _compiler_params()

    # Precomputed 0/1 boundary masks for the depthwise taps (stay VMEM-resident:
    # their block index is constant so Pallas fetches them once).
    pos = jnp.arange(HW, dtype=jnp.int32)
    jcol = pos % W
    irow = pos // W
    masks = jnp.stack(
        [jcol > 0, jcol < W - 1, irow > 0, irow < H - 1]).astype(jnp.float32)

    # ---- pass 1: 1x1 expand conv (+ residual 1x1 conv sharing the x read) ----
    if has_res:
        wr = params["w_res"].astype(jnp.bfloat16)
        pre1, pre_r, st1, st_r = pl.pallas_call(
            expand_res_kernel,
            out_shape=(
                jax.ShapeDtypeStruct((N, Cexp, HW), jnp.bfloat16),
                jax.ShapeDtypeStruct((N, Cout, HW), jnp.bfloat16),
                jax.ShapeDtypeStruct((N, n_hw, Cexp, 2), jnp.float32),
                jax.ShapeDtypeStruct((N, n_hw, Cout, 2), jnp.float32),
            ),
            grid=(N, n_hw),
            in_specs=[
                pl.BlockSpec((1, Cin, t_hw), lambda n, k: (n, 0, k)),
                pl.BlockSpec((Cexp, Cin), lambda n, k: (0, 0)),
                pl.BlockSpec((Cout, Cin), lambda n, k: (0, 0)),
            ],
            out_specs=(
                pl.BlockSpec((1, Cexp, t_hw), lambda n, k: (n, 0, k)),
                pl.BlockSpec((1, Cout, t_hw), lambda n, k: (n, 0, k)),
                pl.BlockSpec((1, 1, Cexp, 2), lambda n, k: (n, k, 0, 0)),
                pl.BlockSpec((1, 1, Cout, 2), lambda n, k: (n, k, 0, 0)),
            ),
            compiler_params=cp,
        )(x, w1, wr)
    else:
        pre1, st1 = pl.pallas_call(
            expand_kernel,
            out_shape=(
                jax.ShapeDtypeStruct((N, Cexp, HW), jnp.bfloat16),
                jax.ShapeDtypeStruct((N, n_hw, Cexp, 2), jnp.float32),
            ),
            grid=(N, n_hw),
            in_specs=[
                pl.BlockSpec((1, Cin, t_hw), lambda n, k: (n, 0, k)),
                pl.BlockSpec((Cexp, Cin), lambda n, k: (0, 0)),
            ],
            out_specs=(
                pl.BlockSpec((1, Cexp, t_hw), lambda n, k: (n, 0, k)),
                pl.BlockSpec((1, 1, Cexp, 2), lambda n, k: (n, k, 0, 0)),
            ),
            compiler_params=cp,
        )(x, w1)
        pre_r, st_r = None, None

    sc1, sh1 = _bn_affine(jnp.sum(st1, axis=(0, 1)), count,
                          params["g1"], params["b1"])

    # ---- pass 2: BN1 + ReLU6 + 3x3 depthwise conv (channel-tiled blocks) ------
    h2, st2 = pl.pallas_call(
        functools.partial(depthwise_kernel, width=W),
        out_shape=(
            jax.ShapeDtypeStruct((N, Cexp, HW), jnp.bfloat16),
            jax.ShapeDtypeStruct((N, n_c, tc, 2), jnp.float32),
        ),
        grid=(N, n_c),
        in_specs=[
            pl.BlockSpec((1, tc, HW), lambda n, c: (n, c, 0)),
            pl.BlockSpec((tc, 9), lambda n, c: (c, 0)),
            pl.BlockSpec((tc, 1), lambda n, c: (c, 0)),
            pl.BlockSpec((tc, 1), lambda n, c: (c, 0)),
            pl.BlockSpec((4, HW), lambda n, c: (0, 0)),
        ],
        out_specs=(
            pl.BlockSpec((1, tc, HW), lambda n, c: (n, c, 0)),
            pl.BlockSpec((1, 1, tc, 2), lambda n, c: (n, c, 0, 0)),
        ),
        compiler_params=cp,
    )(pre1, wdw, sc1, sh1, masks)

    sc2, sh2 = _bn_affine(jnp.sum(st2, axis=0).reshape(Cexp, 2), count,
                          params["g2"], params["b2"])

    # ---- pass 3: BN2 + ReLU6 + 1x1 projection conv ----------------------------
    y_pre, st3 = pl.pallas_call(
        project_kernel,
        out_shape=(
            jax.ShapeDtypeStruct((N, Cout, HW), jnp.bfloat16),
            jax.ShapeDtypeStruct((N, n_hw, Cout, 2), jnp.float32),
        ),
        grid=(N, n_hw),
        in_specs=[
            pl.BlockSpec((1, Cexp, t_hw), lambda n, k: (n, 0, k)),
            pl.BlockSpec((Cexp, 1), lambda n, k: (0, 0)),
            pl.BlockSpec((Cexp, 1), lambda n, k: (0, 0)),
            pl.BlockSpec((Cout, Cexp), lambda n, k: (0, 0)),
        ],
        out_specs=(
            pl.BlockSpec((1, Cout, t_hw), lambda n, k: (n, 0, k)),
            pl.BlockSpec((1, 1, Cout, 2), lambda n, k: (n, k, 0, 0)),
        ),
        compiler_params=cp,
    )(h2, sc2, sh2, w2)

    sc3, sh3 = _bn_affine(jnp.sum(st3, axis=(0, 1)), count,
                          params["g3"], params["b3"])

    # ---- pass 4: BN3 + residual add (output already in NCHW layout) -----------
    if has_res:
        scr, shr = _bn_affine(jnp.sum(st_r, axis=(0, 1)), count,
                              params["gr"], params["br"])
        out = pl.pallas_call(
            finalize_res_kernel,
            out_shape=jax.ShapeDtypeStruct((N, Cout, HW), jnp.float32),
            grid=(N, n_hw),
            in_specs=[
                pl.BlockSpec((1, Cout, t_hw), lambda n, k: (n, 0, k)),
                pl.BlockSpec((Cout, 1), lambda n, k: (0, 0)),
                pl.BlockSpec((Cout, 1), lambda n, k: (0, 0)),
                pl.BlockSpec((1, Cout, t_hw), lambda n, k: (n, 0, k)),
                pl.BlockSpec((Cout, 1), lambda n, k: (0, 0)),
                pl.BlockSpec((Cout, 1), lambda n, k: (0, 0)),
            ],
            out_specs=pl.BlockSpec((1, Cout, t_hw), lambda n, k: (n, 0, k)),
            compiler_params=cp,
        )(y_pre, sc3, sh3, pre_r, scr, shr)
    else:
        out = pl.pallas_call(
            finalize_id_kernel,
            out_shape=jax.ShapeDtypeStruct((N, Cout, HW), jnp.float32),
            grid=(N, n_hw),
            in_specs=[
                pl.BlockSpec((1, Cout, t_hw), lambda n, k: (n, 0, k)),
                pl.BlockSpec((Cout, 1), lambda n, k: (0, 0)),
                pl.BlockSpec((Cout, 1), lambda n, k: (0, 0)),
                pl.BlockSpec((1, Cout, t_hw), lambda n, k: (n, 0, k)),
            ],
            out_specs=pl.BlockSpec((1, Cout, t_hw), lambda n, k: (n, 0, k)),
            compiler_params=cp,
        )(y_pre, sc3, sh3, x)

    return out.reshape(N, Cout, H, W)   # free reshape, already NCHW


if __name__ == "__main__":
    key = jax.random.PRNGKey(0)
    kx, kp = jax.random.split(key)

    # Config 1: in_channels != out_channels -> fused 1x1 res_conv branch.
    x = jax.random.normal(kx, (2, 4, 16, 16), jnp.float32)
    params = init_params(kp, 4, 8, 6)
    out = inverted_residual(x, params, s=1)
    jax.block_until_ready(out)
    assert out.shape == (2, 8, 16, 16)
    assert bool(jnp.all(jnp.isfinite(out)))

    # Config 2: in_channels == out_channels -> identity residual path.
    x2 = jax.random.normal(kx, (2, 8, 16, 16), jnp.float32)
    params2 = init_params(kp, 8, 8, 6)
    out2 = inverted_residual(x2, params2, s=1)
    jax.block_until_ready(out2)
    assert out2.shape == (2, 8, 16, 16)
    assert bool(jnp.all(jnp.isfinite(out2)))

    print("KERNEL_OK")
</pallas_src>

<mosaic_0001>
module attributes {stable_mosaic.version = 11 : i64} {
  func.func @expand_res_kernel(%arg0: i32, %arg1: i32, %arg2: memref<1x4x128xf32, #tpu.memory_space<vmem>>, %arg3: memref<24x4xbf16, #tpu.memory_space<vmem>>, %arg4: memref<8x4xbf16, #tpu.memory_space<vmem>>, %arg5: memref<1x24x128xbf16, #tpu.memory_space<vmem>>, %arg6: memref<1x8x128xbf16, #tpu.memory_space<vmem>>, %arg7: memref<1x1x24x2xf32, #tpu.memory_space<vmem>>, %arg8: memref<1x1x8x2xf32, #tpu.memory_space<vmem>>) attributes {dimension_semantics = [#tpu.dimension_semantics<parallel>, #tpu.dimension_semantics<parallel>], iteration_bounds = array<i64: 2, 2>, scalar_prefetch = 0 : i64, scratch_operands = 0 : i64, tpu.core_type = #tpu.core_type<tc>, window_params = [{transform_indices = @transform_0, window_bounds = array<i64: 1, 4, 128>}, {pipeline_mode = #tpu.pipeline_mode<synchronous>, transform_indices = @transform_1, window_bounds = array<i64: 24, 4>}, {pipeline_mode = #tpu.pipeline_mode<synchronous>, transform_indices = @transform_2, window_bounds = array<i64: 8, 4>}, {transform_indices = @transform_3, window_bounds = array<i64: 1, 24, 128>}, {transform_indices = @transform_4, window_bounds = array<i64: 1, 8, 128>}, {transform_indices = @transform_5, window_bounds = array<i64: 1, 1, 24, 2>}, {transform_indices = @transform_6, window_bounds = array<i64: 1, 1, 8, 2>}]} {
    %c0 = arith.constant 0 : index
    %c0_0 = arith.constant 0 : index
    %c0_1 = arith.constant 0 : index
    %0 = vector.load %arg2[%c0, %c0_0, %c0_1] : memref<1x4x128xf32, #tpu.memory_space<vmem>>, vector<1x4x128xf32>
    %1 = vector.shape_cast %0 : vector<1x4x128xf32> to vector<4x128xf32>
    %2 = arith.truncf %1 : vector<4x128xf32> to vector<4x128xbf16>
    %c0_2 = arith.constant 0 : index
    %c0_3 = arith.constant 0 : index
    %3 = vector.load %arg3[%c0_2, %c0_3] : memref<24x4xbf16, #tpu.memory_space<vmem>>, vector<24x4xbf16>
    %cst = arith.constant dense<0.000000e+00> : vector<24x128xf32>
    %4 = tpu.matmul %3, %2, %cst {dimension_numbers = #tpu.dot_dimension_numbers<[1], [0], [0], [1], [0, 0, 1, 1], [], []>} : vector<24x4xbf16>, vector<4x128xbf16>, vector<24x128xf32> -> vector<24x128xf32>
    %5 = arith.truncf %4 : vector<24x128xf32> to vector<24x128xbf16>
    %c0_4 = arith.constant 0 : index
    %c0_5 = arith.constant 0 : index
    %c0_6 = arith.constant 0 : index
    %6 = vector.load %arg5[%c0_4, %c0_5, %c0_6] : memref<1x24x128xbf16, #tpu.memory_space<vmem>>, vector<1x24x128xbf16>
    %7 = vector.shape_cast %6 : vector<1x24x128xbf16> to vector<24x128xbf16>
    %8 = vector.shape_cast %5 : vector<24x128xbf16> to vector<1x24x128xbf16>
    tpu.vector_store %arg5[%c0_4, %c0_5, %c0_6], %8 {strides = array<i32>} : memref<1x24x128xbf16, #tpu.memory_space<vmem>>, vector<1x24x128xbf16>,
    %cst_7 = arith.constant dense<0.000000e+00> : vector<24xf32>
    %9 = vector.multi_reduction <add>, %4, %cst_7 [1] : vector<24x128xf32> to vector<24xf32>
    %10 = vector.shape_cast %9 : vector<24xf32> to vector<24x1xf32>
    %11 = vector.shape_cast %10 : vector<24x1xf32> to vector<1x1x24x1xf32>
    %c0_8 = arith.constant 0 : index
    %c0_9 = arith.constant 0 : index
    %c0_10 = arith.constant 0 : index
    %c0_11 = arith.constant 0 : index
    %12 = vector.load %arg7[%c0_8, %c0_9, %c0_10, %c0_11] : memref<1x1x24x2xf32, #tpu.memory_space<vmem>>, vector<1x1x24x1xf32>
    tpu.vector_store %arg7[%c0_8, %c0_9, %c0_10, %c0_11], %11 {strides = array<i32>} : memref<1x1x24x2xf32, #tpu.memory_space<vmem>>, vector<1x1x24x1xf32>,
    %13 = arith.mulf %4, %4 : vector<24x128xf32>
    %cst_12 = arith.constant dense<0.000000e+00> : vector<24xf32>
    %14 = vector.multi_reduction <add>, %13, %cst_12 [1] : vector<24x128xf32> to vector<24xf32>
    %15 = vector.shape_cast %14 : vector<24xf32> to vector<24x1xf32>
    %16 = vector.shape_cast %15 : vector<24x1xf32> to vector<1x1x24x1xf32>
    %c0_13 = arith.constant 0 : index
    %c0_14 = arith.constant 0 : index
    %c0_15 = arith.constant 0 : index
    %c1 = arith.constant 1 : index
    %17 = vector.load %arg7[%c0_13, %c0_14, %c0_15, %c1] : memref<1x1x24x2xf32, #tpu.memory_space<vmem>>, vector<1x1x24x1xf32>
    tpu.vector_store %arg7[%c0_13, %c0_14, %c0_15, %c1], %16 {strides = array<i32>} : memref<1x1x24x2xf32, #tpu.memory_space<vmem>>, vector<1x1x24x1xf32>,
    %c0_16 = arith.constant 0 : index
    %c0_17 = arith.constant 0 : index
    %18 = vector.load %arg4[%c0_16, %c0_17] : memref<8x4xbf16, #tpu.memory_space<vmem>>, vector<8x4xbf16>
    %cst_18 = arith.constant dense<0.000000e+00> : vector<8x128xf32>
    %19 = tpu.matmul %18, %2, %cst_18 {dimension_numbers = #tpu.dot_dimension_numbers<[1], [0], [0], [1], [0, 0, 1, 1], [], []>} : vector<8x4xbf16>, vector<4x128xbf16>, vector<8x128xf32> -> vector<8x128xf32>
    %20 = arith.truncf %19 : vector<8x128xf32> to vector<8x128xbf16>
    %c0_19 = arith.constant 0 : index
    %c0_20 = arith.constant 0 : index
    %c0_21 = arith.constant 0 : index
    %21 = vector.load %arg6[%c0_19, %c0_20, %c0_21] : memref<1x8x128xbf16, #tpu.memory_space<vmem>>, vector<1x8x128xbf16>
    %22 = vector.shape_cast %21 : vector<1x8x128xbf16> to vector<8x128xbf16>
    %23 = vector.shape_cast %20 : vector<8x128xbf16> to vector<1x8x128xbf16>
    tpu.vector_store %arg6[%c0_19, %c0_20, %c0_21], %23 {strides = array<i32>} : memref<1x8x128xbf16, #tpu.memory_space<vmem>>, vector<1x8x128xbf16>,
    %cst_22 = arith.constant dense<0.000000e+00> : vector<8xf32>
    %24 = vector.multi_reduction <add>, %19, %cst_22 [1] : vector<8x128xf32> to vector<8xf32>
    %25 = vector.shape_cast %24 : vector<8xf32> to vector<8x1xf32>
    %26 = vector.shape_cast %25 : vector<8x1xf32> to vector<1x1x8x1xf32>
    %c0_23 = arith.constant 0 : index
    %c0_24 = arith.constant 0 : index
    %c0_25 = arith.constant 0 : index
    %c0_26 = arith.constant 0 : index
    %27 = vector.load %arg8[%c0_23, %c0_24, %c0_25, %c0_26] : memref<1x1x8x2xf32, #tpu.memory_space<vmem>>, vector<1x1x8x1xf32>
    tpu.vector_store %arg8[%c0_23, %c0_24, %c0_25, %c0_26], %26 {strides = array<i32>} : memref<1x1x8x2xf32, #tpu.memory_space<vmem>>, vector<1x1x8x1xf32>,
    %28 = arith.mulf %19, %19 : vector<8x128xf32>
    %cst_27 = arith.constant dense<0.000000e+00> : vector<8xf32>
    %29 = vector.multi_reduction <add>, %28, %cst_27 [1] : vector<8x128xf32> to vector<8xf32>
    %30 = vector.shape_cast %29 : vector<8xf32> to vector<8x1xf32>
    %31 = vector.shape_cast %30 : vector<8x1xf32> to vector<1x1x8x1xf32>
    %c0_28 = arith.constant 0 : index
    %c0_29 = arith.constant 0 : index
    %c0_30 = arith.constant 0 : index
    %c1_31 = arith.constant 1 : index
    %32 = vector.load %arg8[%c0_28, %c0_29, %c0_30, %c1_31] : memref<1x1x8x2xf32, #tpu.memory_space<vmem>>, vector<1x1x8x1xf32>
    tpu.vector_store %arg8[%c0_28, %c0_29, %c0_30, %c1_31], %31 {strides = array<i32>} : memref<1x1x8x2xf32, #tpu.memory_space<vmem>>, vector<1x1x8x1xf32>,
    return
  }
  func.func @transform_0(%arg0: i32, %arg1: i32) -> (i32, i32, i32) {
    %c0_i32 = arith.constant 0 : i32
    %c0_i32_0 = arith.constant 0 : i32
    return %arg0, %c0_i32, %arg1 : i32, i32, i32
  }
  func.func @transform_1(%arg0: i32, %arg1: i32) -> (i32, i32) {
    %c0_i32 = arith.constant 0 : i32
    %c0_i32_0 = arith.constant 0 : i32
    %c0_i32_1 = arith.constant 0 : i32
    return %c0_i32, %c0_i32_0 : i32, i32
  }
  func.func @transform_2(%arg0: i32, %arg1: i32) -> (i32, i32) {
    %c0_i32 = arith.constant 0 : i32
    %c0_i32_0 = arith.constant 0 : i32
    %c0_i32_1 = arith.constant 0 : i32
    return %c0_i32, %c0_i32_0 : i32, i32
  }
  func.func @transform_3(%arg0: i32, %arg1: i32) -> (i32, i32, i32) {
    %c0_i32 = arith.constant 0 : i32
    %c0_i32_0 = arith.constant 0 : i32
    return %arg0, %c0_i32, %arg1 : i32, i32, i32
  }
  func.func @transform_4(%arg0: i32, %arg1: i32) -> (i32, i32, i32) {
    %c0_i32 = arith.constant 0 : i32
    %c0_i32_0 = arith.constant 0 : i32
    return %arg0, %c0_i32, %arg1 : i32, i32, i32
  }
  func.func @transform_5(%arg0: i32, %arg1: i32) -> (i32, i32, i32, i32) {
    %c0_i32 = arith.constant 0 : i32
    %c0_i32_0 = arith.constant 0 : i32
    %c0_i32_1 = arith.constant 0 : i32
    return %arg0, %arg1, %c0_i32, %c0_i32_0 : i32, i32, i32, i32
  }
  func.func @transform_6(%arg0: i32, %arg1: i32) -> (i32, i32, i32, i32) {
    %c0_i32 = arith.constant 0 : i32
    %c0_i32_0 = arith.constant 0 : i32
    %c0_i32_1 = arith.constant 0 : i32
    return %arg0, %arg1, %c0_i32, %c0_i32_0 : i32, i32, i32, i32
  }
}

module attributes {stable_mosaic.version = 11 : i64} {
  func.func @depthwise_kernel(%arg0: i32, %arg1: i32, %arg2: memref<1x8x256xbf16, #tpu.memory_space<vmem>>, %arg3: memref<8x9xf32, #tpu.memory_space<vmem>>, %arg4: memref<8x1xf32, #tpu.memory_space<vmem>>, %arg5: memref<8x1xf32, #tpu.memory_space<vmem>>, %arg6: memref<4x256xf32, #tpu.memory_space<vmem>>, %arg7: memref<1x8x256xbf16, #tpu.memory_space<vmem>>, %arg8: memref<1x1x8x2xf32, #tpu.memory_space<vmem>>) attributes {dimension_semantics = [#tpu.dimension_semantics<parallel>, #tpu.dimension_semantics<parallel>], iteration_bounds = array<i64: 2, 3>, scalar_prefetch = 0 : i64, scratch_operands = 0 : i64, tpu.core_type = #tpu.core_type<tc>, window_params = [{transform_indices = @transform_0, window_bounds = array<i64: 1, 8, 256>}, {transform_indices = @transform_1, window_bounds = array<i64: 8, 9>}, {transform_indices = @transform_2, window_bounds = array<i64: 8, 1>}, {transform_indices = @transform_3, window_bounds = array<i64: 8, 1>}, {pipeline_mode = #tpu.pipeline_mode<synchronous>, transform_indices = @transform_4, window_bounds = array<i64: 4, 256>}, {transform_indices = @transform_5, window_bounds = array<i64: 1, 8, 256>}, {transform_indices = @transform_6, window_bounds = array<i64: 1, 1, 8, 2>}]} {
    %c0 = arith.constant 0 : index
    %c0_0 = arith.constant 0 : index
    %c0_1 = arith.constant 0 : index
    %0 = vector.load %arg2[%c0, %c0_0, %c0_1] : memref<1x8x256xbf16, #tpu.memory_space<vmem>>, vector<1x8x256xbf16>
    %1 = vector.shape_cast %0 : vector<1x8x256xbf16> to vector<8x256xbf16>
    %2 = arith.extf %1 : vector<8x256xbf16> to vector<8x256xf32>
    %c0_2 = arith.constant 0 : index
    %c0_3 = arith.constant 0 : index
    %3 = vector.load %arg4[%c0_2, %c0_3] : memref<8x1xf32, #tpu.memory_space<vmem>>, vector<8x1xf32>
    %4 = vector.broadcast %3 : vector<8x1xf32> to vector<8x256xf32>
    %5 = arith.mulf %2, %4 : vector<8x256xf32>
    %c0_4 = arith.constant 0 : index
    %c0_5 = arith.constant 0 : index
    %6 = vector.load %arg5[%c0_4, %c0_5] : memref<8x1xf32, #tpu.memory_space<vmem>>, vector<8x1xf32>
    %7 = vector.broadcast %6 : vector<8x1xf32> to vector<8x256xf32>
    %8 = arith.addf %5, %7 : vector<8x256xf32>
    %cst = arith.constant 0.000000e+00 : f32
    %cst_6 = arith.constant 6.000000e+00 : f32
    %9 = vector.broadcast %cst : f32 to vector<8x256xf32>
    %10 = arith.maximumf %9, %8 : vector<8x256xf32>
    %11 = vector.broadcast %cst_6 : f32 to vector<8x256xf32>
    %12 = arith.minimumf %11, %10 : vector<8x256xf32>
    %c0_7 = arith.constant 0 : index
    %c0_8 = arith.constant 0 : index
    %13 = vector.load %arg3[%c0_7, %c0_8] : memref<8x9xf32, #tpu.memory_space<vmem>>, vector<8x9xf32>
    %c0_9 = arith.constant 0 : index
    %c0_10 = arith.constant 0 : index
    %14 = vector.load %arg6[%c0_9, %c0_10] : memref<4x256xf32, #tpu.memory_space<vmem>>, vector<1x256xf32>
    %c1 = arith.constant 1 : index
    %c0_11 = arith.constant 0 : index
    %15 = vector.load %arg6[%c1, %c0_11] : memref<4x256xf32, #tpu.memory_space<vmem>>, vector<1x256xf32>
    %c2 = arith.constant 2 : index
    %c0_12 = arith.constant 0 : index
    %16 = vector.load %arg6[%c2, %c0_12] : memref<4x256xf32, #tpu.memory_space<vmem>>, vector<1x256xf32>
    %c3 = arith.constant 3 : index
    %c0_13 = arith.constant 0 : index
    %17 = vector.load %arg6[%c3, %c0_13] : memref<4x256xf32, #tpu.memory_space<vmem>>, vector<1x256xf32>
    %18 = vector.extract_strided_slice %13 {offsets = [0, 4], sizes = [8, 1], strides = [1, 1]} : vector<8x9xf32> to vector<8x1xf32>
    %19 = vector.broadcast %18 : vector<8x1xf32> to vector<8x256xf32>
    %20 = arith.mulf %12, %19 : vector<8x256xf32>
    %c17_i32 = arith.constant 17 : i32
    %21 = tpu.dynamic_rotate %12 by %c17_i32 dim 1 : vector<8x256xf32>, i32 -> vector<8x256xf32>
    %22 = arith.mulf %16, %14 : vector<1x256xf32>
    %23 = vector.broadcast %22 : vector<1x256xf32> to vector<8x256xf32>
    %24 = arith.mulf %21, %23 : vector<8x256xf32>
    %25 = vector.extract_strided_slice %13 {offsets = [0, 0], sizes = [8, 1], strides = [1, 1]} : vector<8x9xf32> to vector<8x1xf32>
    %26 = vector.broadcast %25 : vector<8x1xf32> to vector<8x256xf32>
    %27 = arith.mulf %24, %26 : vector<8x256xf32>
    %28 = arith.addf %20, %27 : vector<8x256xf32>
    %c16_i32 = arith.constant 16 : i32
    %29 = tpu.dynamic_rotate %12 by %c16_i32 dim 1 : vector<8x256xf32>, i32 -> vector<8x256xf32>
    %30 = vector.broadcast %16 : vector<1x256xf32> to vector<8x256xf32>
    %31 = arith.mulf %29, %30 : vector<8x256xf32>
    %32 = vector.extract_strided_slice %13 {offsets = [0, 1], sizes = [8, 1], strides = [1, 1]} : vector<8x9xf32> to vector<8x1xf32>
    %33 = vector.broadcast %32 : vector<8x1xf32> to vector<8x256xf32>
    %34 = arith.mulf %31, %33 : vector<8x256xf32>
    %35 = arith.addf %28, %34 : vector<8x256xf32>
    %c15_i32 = arith.constant 15 : i32
    %36 = tpu.dynamic_rotate %12 by %c15_i32 dim 1 : vector<8x256xf32>, i32 -> vector<8x256xf32>
    %37 = arith.mulf %16, %15 : vector<1x256xf32>
    %38 = vector.broadcast %37 : vector<1x256xf32> to vector<8x256xf32>
    %39 = arith.mulf %36, %38 : vector<8x256xf32>
    %40 = vector.extract_strided_slice %13 {offsets = [0, 2], sizes = [8, 1], strides = [1, 1]} : vector<8x9xf32> to vector<8x1xf32>
    %41 = vector.broadcast %40 : vector<8x1xf32> to vector<8x256xf32>
    %42 = arith.mulf %39, %41 : vector<8x256xf32>
    %43 = arith.addf %35, %42 : vector<8x256xf32>
    %c1_i32 = arith.constant 1 : i32
    %44 = tpu.dynamic_rotate %12 by %c1_i32 dim 1 : vector<8x256xf32>, i32 -> vector<8x256xf32>
    %45 = vector.broadcast %14 : vector<1x256xf32> to vector<8x256xf32>
    %46 = arith.mulf %44, %45 : vector<8x256xf32>
    %47 = vector.extract_strided_slice %13 {offsets = [0, 3], sizes = [8, 1], strides = [1, 1]} : vector<8x9xf32> to vector<8x1xf32>
    %48 = vector.broadcast %47 : vector<8x1xf32> to vector<8x256xf32>
    %49 = arith.mulf %46, %48 : vector<8x256xf32>
    %50 = arith.addf %43, %49 : vector<8x256xf32>
    %c255_i32 = arith.constant 255 : i32
    %51 = tpu.dynamic_rotate %12 by %c255_i32 dim 1 : vector<8x256xf32>, i32 -> vector<8x256xf32>
    %52 = vector.broadcast %15 : vector<1x256xf32> to vector<8x256xf32>
    %53 = arith.mulf %51, %52 : vector<8x256xf32>
    %54 = vector.extract_strided_slice %13 {offsets = [0, 5], sizes = [8, 1], strides = [1, 1]} : vector<8x9xf32> to vector<8x1xf32>
    %55 = vector.broadcast %54 : vector<8x1xf32> to vector<8x256xf32>
    %56 = arith.mulf %53, %55 : vector<8x256xf32>
    %57 = arith.addf %50, %56 : vector<8x256xf32>
    %c241_i32 = arith.constant 241 : i32
    %58 = tpu.dynamic_rotate %12 by %c241_i32 dim 1 : vector<8x256xf32>, i32 -> vector<8x256xf32>
    %59 = arith.mulf %17, %14 : vector<1x256xf32>
    %60 = vector.broadcast %59 : vector<1x256xf32> to vector<8x256xf32>
    %61 = arith.mulf %58, %60 : vector<8x256xf32>
    %62 = vector.extract_strided_slice %13 {offsets = [0, 6], sizes = [8, 1], strides = [1, 1]} : vector<8x9xf32> to vector<8x1xf32>
    %63 = vector.broadcast %62 : vector<8x1xf32> to vector<8x256xf32>
    %64 = arith.mulf %61, %63 : vector<8x256xf32>
    %65 = arith.addf %57, %64 : vector<8x256xf32>
    %c240_i32 = arith.constant 240 : i32
    %66 = tpu.dynamic_rotate %12 by %c240_i32 dim 1 : vector<8x256xf32>, i32 -> vector<8x256xf32>
    %67 = vector.broadcast %17 : vector<1x256xf32> to vector<8x256xf32>
    %68 = arith.mulf %66, %67 : vector<8x256xf32>
    %69 = vector.extract_strided_slice %13 {offsets = [0, 7], sizes = [8, 1], strides = [1, 1]} : vector<8x9xf32> to vector<8x1xf32>
    %70 = vector.broadcast %69 : vector<8x1xf32> to vector<8x256xf32>
    %71 = arith.mulf %68, %70 : vector<8x256xf32>
    %72 = arith.addf %65, %71 : vector<8x256xf32>
    %c239_i32 = arith.constant 239 : i32
    %73 = tpu.dynamic_rotate %12 by %c239_i32 dim 1 : vector<8x256xf32>, i32 -> vector<8x256xf32>
    %74 = arith.mulf %17, %15 : vector<1x256xf32>
    %75 = vector.broadcast %74 : vector<1x256xf32> to vector<8x256xf32>
    %76 = arith.mulf %73, %75 : vector<8x256xf32>
    %77 = vector.extract_strided_slice %13 {offsets = [0, 8], sizes = [8, 1], strides = [1, 1]} : vector<8x9xf32> to vector<8x1xf32>
    %78 = vector.broadcast %77 : vector<8x1xf32> to vector<8x256xf32>
    %79 = arith.mulf %76, %78 : vector<8x256xf32>
    %80 = arith.addf %72, %79 : vector<8x256xf32>
    %81 = arith.truncf %80 : vector<8x256xf32> to vector<8x256xbf16>
    %c0_14 = arith.constant 0 : index
    %c0_15 = arith.constant 0 : index
    %c0_16 = arith.constant 0 : index
    %82 = vector.load %arg7[%c0_14, %c0_15, %c0_16] : memref<1x8x256xbf16, #tpu.memory_space<vmem>>, vector<1x8x256xbf16>
    %83 = vector.shape_cast %82 : vector<1x8x256xbf16> to vector<8x256xbf16>
    %84 = vector.shape_cast %81 : vector<8x256xbf16> to vector<1x8x256xbf16>
    tpu.vector_store %arg7[%c0_14, %c0_15, %c0_16], %84 {strides = array<i32>} : memref<1x8x256xbf16, #tpu.memory_space<vmem>>, vector<1x8x256xbf16>,
    %cst_17 = arith.constant dense<0.000000e+00> : vector<8xf32>
    %85 = vector.multi_reduction <add>, %80, %cst_17 [1] : vector<8x256xf32> to vector<8xf32>
    %86 = vector.shape_cast %85 : vector<8xf32> to vector<8x1xf32>
    %87 = vector.shape_cast %86 : vector<8x1xf32> to vector<1x1x8x1xf32>
    %c0_18 = arith.constant 0 : index
    %c0_19 = arith.constant 0 : index
    %c0_20 = arith.constant 0 : index
    %c0_21 = arith.constant 0 : index
    %88 = vector.load %arg8[%c0_18, %c0_19, %c0_20, %c0_21] : memref<1x1x8x2xf32, #tpu.memory_space<vmem>>, vector<1x1x8x1xf32>
    tpu.vector_store %arg8[%c0_18, %c0_19, %c0_20, %c0_21], %87 {strides = array<i32>} : memref<1x1x8x2xf32, #tpu.memory_space<vmem>>, vector<1x1x8x1xf32>,
    %89 = arith.mulf %80, %80 : vector<8x256xf32>
    %cst_22 = arith.constant dense<0.000000e+00> : vector<8xf32>
    %90 = vector.multi_reduction <add>, %89, %cst_22 [1] : vector<8x256xf32> to vector<8xf32>
    %91 = vector.shape_cast %90 : vector<8xf32> to vector<8x1xf32>
    %92 = vector.shape_cast %91 : vector<8x1xf32> to vector<1x1x8x1xf32>
    %c0_23 = arith.constant 0 : index
    %c0_24 = arith.constant 0 : index
    %c0_25 = arith.constant 0 : index
    %c1_26 = arith.constant 1 : index
    %93 = vector.load %arg8[%c0_23, %c0_24, %c0_25, %c1_26] : memref<1x1x8x2xf32, #tpu.memory_space<vmem>>, vector<1x1x8x1xf32>
    tpu.vector_store %arg8[%c0_23, %c0_24, %c0_25, %c1_26], %92 {strides = array<i32>} : memref<1x1x8x2xf32, #tpu.memory_space<vmem>>, vector<1x1x8x1xf32>,
    return
  }
  func.func @transform_0(%arg0: i32, %arg1: i32) -> (i32, i32, i32) {
    %c0_i32 = arith.constant 0 : i32
    %c0_i32_0 = arith.constant 0 : i32
    return %arg0, %arg1, %c0_i32 : i32, i32, i32
  }
  func.func @transform_1(%arg0: i32, %arg1: i32) -> (i32, i32) {
    %c0_i32 = arith.constant 0 : i32
    %c0_i32_0 = arith.constant 0 : i32
    return %arg1, %c0_i32 : i32, i32
  }
  func.func @transform_2(%arg0: i32, %arg1: i32) -> (i32, i32) {
    %c0_i32 = arith.constant 0 : i32
    %c0_i32_0 = arith.constant 0 : i32
    return %arg1, %c0_i32 : i32, i32
  }
  func.func @transform_3(%arg0: i32, %arg1: i32) -> (i32, i32) {
    %c0_i32 = arith.constant 0 : i32
    %c0_i32_0 = arith.constant 0 : i32
    return %arg1, %c0_i32 : i32, i32
  }
  func.func @transform_4(%arg0: i32, %arg1: i32) -> (i32, i32) {
    %c0_i32 = arith.constant 0 : i32
    %c0_i32_0 = arith.constant 0 : i32
    %c0_i32_1 = arith.constant 0 : i32
    return %c0_i32, %c0_i32_0 : i32, i32
  }
  func.func @transform_5(%arg0: i32, %arg1: i32) -> (i32, i32, i32) {
    %c0_i32 = arith.constant 0 : i32
    %c0_i32_0 = arith.constant 0 : i32
    return %arg0, %arg1, %c0_i32 : i32, i32, i32
  }
  func.func @transform_6(%arg0: i32, %arg1: i32) -> (i32, i32, i32, i32) {
    %c0_i32 = arith.constant 0 : i32
    %c0_i32_0 = arith.constant 0 : i32
    %c0_i32_1 = arith.constant 0 : i32
    return %arg0, %arg1, %c0_i32, %c0_i32_0 : i32, i32, i32, i32
  }
}

module attributes {stable_mosaic.version = 11 : i64} {
  func.func @project_kernel(%arg0: i32, %arg1: i32, %arg2: memref<1x24x128xbf16, #tpu.memory_space<vmem>>, %arg3: memref<24x1xf32, #tpu.memory_space<vmem>>, %arg4: memref<24x1xf32, #tpu.memory_space<vmem>>, %arg5: memref<8x24xbf16, #tpu.memory_space<vmem>>, %arg6: memref<1x8x128xbf16, #tpu.memory_space<vmem>>, %arg7: memref<1x1x8x2xf32, #tpu.memory_space<vmem>>) attributes {dimension_semantics = [#tpu.dimension_semantics<parallel>, #tpu.dimension_semantics<parallel>], iteration_bounds = array<i64: 2, 2>, scalar_prefetch = 0 : i64, scratch_operands = 0 : i64, tpu.core_type = #tpu.core_type<tc>, window_params = [{transform_indices = @transform_0, window_bounds = array<i64: 1, 24, 128>}, {pipeline_mode = #tpu.pipeline_mode<synchronous>, transform_indices = @transform_1, window_bounds = array<i64: 24, 1>}, {pipeline_mode = #tpu.pipeline_mode<synchronous>, transform_indices = @transform_2, window_bounds = array<i64: 24, 1>}, {pipeline_mode = #tpu.pipeline_mode<synchronous>, transform_indices = @transform_3, window_bounds = array<i64: 8, 24>}, {transform_indices = @transform_4, window_bounds = array<i64: 1, 8, 128>}, {transform_indices = @transform_5, window_bounds = array<i64: 1, 1, 8, 2>}]} {
    %c0 = arith.constant 0 : index
    %c0_0 = arith.constant 0 : index
    %c0_1 = arith.constant 0 : index
    %0 = vector.load %arg2[%c0, %c0_0, %c0_1] : memref<1x24x128xbf16, #tpu.memory_space<vmem>>, vector<1x24x128xbf16>
    %1 = vector.shape_cast %0 : vector<1x24x128xbf16> to vector<24x128xbf16>
    %2 = arith.extf %1 : vector<24x128xbf16> to vector<24x128xf32>
    %c0_2 = arith.constant 0 : index
    %c0_3 = arith.constant 0 : index
    %3 = vector.load %arg3[%c0_2, %c0_3] : memref<24x1xf32, #tpu.memory_space<vmem>>, vector<24x1xf32>
    %4 = vector.broadcast %3 : vector<24x1xf32> to vector<24x128xf32>
    %5 = arith.mulf %2, %4 : vector<24x128xf32>
    %c0_4 = arith.constant 0 : index
    %c0_5 = arith.constant 0 : index
    %6 = vector.load %arg4[%c0_4, %c0_5] : memref<24x1xf32, #tpu.memory_space<vmem>>, vector<24x1xf32>
    %7 = vector.broadcast %6 : vector<24x1xf32> to vector<24x128xf32>
    %8 = arith.addf %5, %7 : vector<24x128xf32>
    %cst = arith.constant 0.000000e+00 : f32
    %cst_6 = arith.constant 6.000000e+00 : f32
    %9 = vector.broadcast %cst : f32 to vector<24x128xf32>
    %10 = arith.maximumf %9, %8 : vector<24x128xf32>
    %11 = vector.broadcast %cst_6 : f32 to vector<24x128xf32>
    %12 = arith.minimumf %11, %10 : vector<24x128xf32>
    %c0_7 = arith.constant 0 : index
    %c0_8 = arith.constant 0 : index
    %13 = vector.load %arg5[%c0_7, %c0_8] : memref<8x24xbf16, #tpu.memory_space<vmem>>, vector<8x24xbf16>
    %14 = arith.truncf %12 : vector<24x128xf32> to vector<24x128xbf16>
    %cst_9 = arith.constant dense<0.000000e+00> : vector<8x128xf32>
    %15 = tpu.matmul %13, %14, %cst_9 {dimension_numbers = #tpu.dot_dimension_numbers<[1], [0], [0], [1], [0, 0, 1, 1], [], []>} : vector<8x24xbf16>, vector<24x128xbf16>, vector<8x128xf32> -> vector<8x128xf32>
    %16 = arith.truncf %15 : vector<8x128xf32> to vector<8x128xbf16>
    %c0_10 = arith.constant 0 : index
    %c0_11 = arith.constant 0 : index
    %c0_12 = arith.constant 0 : index
    %17 = vector.load %arg6[%c0_10, %c0_11, %c0_12] : memref<1x8x128xbf16, #tpu.memory_space<vmem>>, vector<1x8x128xbf16>
    %18 = vector.shape_cast %17 : vector<1x8x128xbf16> to vector<8x128xbf16>
    %19 = vector.shape_cast %16 : vector<8x128xbf16> to vector<1x8x128xbf16>
    tpu.vector_store %arg6[%c0_10, %c0_11, %c0_12], %19 {strides = array<i32>} : memref<1x8x128xbf16, #tpu.memory_space<vmem>>, vector<1x8x128xbf16>,
    %cst_13 = arith.constant dense<0.000000e+00> : vector<8xf32>
    %20 = vector.multi_reduction <add>, %15, %cst_13 [1] : vector<8x128xf32> to vector<8xf32>
    %21 = vector.shape_cast %20 : vector<8xf32> to vector<8x1xf32>
    %22 = vector.shape_cast %21 : vector<8x1xf32> to vector<1x1x8x1xf32>
    %c0_14 = arith.constant 0 : index
    %c0_15 = arith.constant 0 : index
    %c0_16 = arith.constant 0 : index
    %c0_17 = arith.constant 0 : index
    %23 = vector.load %arg7[%c0_14, %c0_15, %c0_16, %c0_17] : memref<1x1x8x2xf32, #tpu.memory_space<vmem>>, vector<1x1x8x1xf32>
    tpu.vector_store %arg7[%c0_14, %c0_15, %c0_16, %c0_17], %22 {strides = array<i32>} : memref<1x1x8x2xf32, #tpu.memory_space<vmem>>, vector<1x1x8x1xf32>,
    %24 = arith.mulf %15, %15 : vector<8x128xf32>
    %cst_18 = arith.constant dense<0.000000e+00> : vector<8xf32>
    %25 = vector.multi_reduction <add>, %24, %cst_18 [1] : vector<8x128xf32> to vector<8xf32>
    %26 = vector.shape_cast %25 : vector<8xf32> to vector<8x1xf32>
    %27 = vector.shape_cast %26 : vector<8x1xf32> to vector<1x1x8x1xf32>
    %c0_19 = arith.constant 0 : index
    %c0_20 = arith.constant 0 : index
    %c0_21 = arith.constant 0 : index
    %c1 = arith.constant 1 : index
    %28 = vector.load %arg7[%c0_19, %c0_20, %c0_21, %c1] : memref<1x1x8x2xf32, #tpu.memory_space<vmem>>, vector<1x1x8x1xf32>
    tpu.vector_store %arg7[%c0_19, %c0_20, %c0_21, %c1], %27 {strides = array<i32>} : memref<1x1x8x2xf32, #tpu.memory_space<vmem>>, vector<1x1x8x1xf32>,
    return
  }
  func.func @transform_0(%arg0: i32, %arg1: i32) -> (i32, i32, i32) {
    %c0_i32 = arith.constant 0 : i32
    %c0_i32_0 = arith.constant 0 : i32
    return %arg0, %c0_i32, %arg1 : i32, i32, i32
  }
  func.func @transform_1(%arg0: i32, %arg1: i32) -> (i32, i32) {
    %c0_i32 = arith.constant 0 : i32
    %c0_i32_0 = arith.constant 0 : i32
    %c0_i32_1 = arith.constant 0 : i32
    return %c0_i32, %c0_i32_0 : i32, i32
  }
  func.func @transform_2(%arg0: i32, %arg1: i32) -> (i32, i32) {
    %c0_i32 = arith.constant 0 : i32
    %c0_i32_0 = arith.constant 0 : i32
    %c0_i32_1 = arith.constant 0 : i32
    return %c0_i32, %c0_i32_0 : i32, i32
  }
  func.func @transform_3(%arg0: i32, %arg1: i32) -> (i32, i32) {
    %c0_i32 = arith.constant 0 : i32
    %c0_i32_0 = arith.constant 0 : i32
    %c0_i32_1 = arith.constant 0 : i32
    return %c0_i32, %c0_i32_0 : i32, i32
  }
  func.func @transform_4(%arg0: i32, %arg1: i32) -> (i32, i32, i32) {
    %c0_i32 = arith.constant 0 : i32
    %c0_i32_0 = arith.constant 0 : i32
    return %arg0, %c0_i32, %arg1 : i32, i32, i32
  }
  func.func @transform_5(%arg0: i32, %arg1: i32) -> (i32, i32, i32, i32) {
    %c0_i32 = arith.constant 0 : i32
    %c0_i32_0 = arith.constant 0 : i32
    %c0_i32_1 = arith.constant 0 : i32
    return %arg0, %arg1, %c0_i32, %c0_i32_0 : i32, i32, i32, i32
  }
}

module attributes {stable_mosaic.version = 11 : i64} {
  func.func @finalize_res_kernel(%arg0: i32, %arg1: i32, %arg2: memref<1x8x128xbf16, #tpu.memory_space<vmem>>, %arg3: memref<8x1xf32, #tpu.memory_space<vmem>>, %arg4: memref<8x1xf32, #tpu.memory_space<vmem>>, %arg5: memref<1x8x128xbf16, #tpu.memory_space<vmem>>, %arg6: memref<8x1xf32, #tpu.memory_space<vmem>>, %arg7: memref<8x1xf32, #tpu.memory_space<vmem>>, %arg8: memref<1x8x128xf32, #tpu.memory_space<vmem>>) attributes {dimension_semantics = [#tpu.dimension_semantics<parallel>, #tpu.dimension_semantics<parallel>], iteration_bounds = array<i64: 2, 2>, scalar_prefetch = 0 : i64, scratch_operands = 0 : i64, tpu.core_type = #tpu.core_type<tc>, window_params = [{transform_indices = @transform_0, window_bounds = array<i64: 1, 8, 128>}, {pipeline_mode = #tpu.pipeline_mode<synchronous>, transform_indices = @transform_1, window_bounds = array<i64: 8, 1>}, {pipeline_mode = #tpu.pipeline_mode<synchronous>, transform_indices = @transform_2, window_bounds = array<i64: 8, 1>}, {transform_indices = @transform_3, window_bounds = array<i64: 1, 8, 128>}, {pipeline_mode = #tpu.pipeline_mode<synchronous>, transform_indices = @transform_4, window_bounds = array<i64: 8, 1>}, {pipeline_mode = #tpu.pipeline_mode<synchronous>, transform_indices = @transform_5, window_bounds = array<i64: 8, 1>}, {transform_indices = @transform_6, window_bounds = array<i64: 1, 8, 128>}]} {
    %c0 = arith.constant 0 : index
    %c0_0 = arith.constant 0 : index
    %c0_1 = arith.constant 0 : index
    %0 = vector.load %arg2[%c0, %c0_0, %c0_1] : memref<1x8x128xbf16, #tpu.memory_space<vmem>>, vector<1x8x128xbf16>
    %1 = vector.shape_cast %0 : vector<1x8x128xbf16> to vector<8x128xbf16>
    %2 = arith.extf %1 : vector<8x128xbf16> to vector<8x128xf32>
    %c0_2 = arith.constant 0 : index
    %c0_3 = arith.constant 0 : index
    %3 = vector.load %arg3[%c0_2, %c0_3] : memref<8x1xf32, #tpu.memory_space<vmem>>, vector<8x1xf32>
    %4 = vector.broadcast %3 : vector<8x1xf32> to vector<8x128xf32>
    %5 = arith.mulf %2, %4 : vector<8x128xf32>
    %c0_4 = arith.constant 0 : index
    %c0_5 = arith.constant 0 : index
    %6 = vector.load %arg4[%c0_4, %c0_5] : memref<8x1xf32, #tpu.memory_space<vmem>>, vector<8x1xf32>
    %7 = vector.broadcast %6 : vector<8x1xf32> to vector<8x128xf32>
    %8 = arith.addf %5, %7 : vector<8x128xf32>
    %c0_6 = arith.constant 0 : index
    %c0_7 = arith.constant 0 : index
    %c0_8 = arith.constant 0 : index
    %9 = vector.load %arg5[%c0_6, %c0_7, %c0_8] : memref<1x8x128xbf16, #tpu.memory_space<vmem>>, vector<1x8x128xbf16>
    %10 = vector.shape_cast %9 : vector<1x8x128xbf16> to vector<8x128xbf16>
    %11 = arith.extf %10 : vector<8x128xbf16> to vector<8x128xf32>
    %c0_9 = arith.constant 0 : index
    %c0_10 = arith.constant 0 : index
    %12 = vector.load %arg6[%c0_9, %c0_10] : memref<8x1xf32, #tpu.memory_space<vmem>>, vector<8x1xf32>
    %13 = vector.broadcast %12 : vector<8x1xf32> to vector<8x128xf32>
    %14 = arith.mulf %11, %13 : vector<8x128xf32>
    %c0_11 = arith.constant 0 : index
    %c0_12 = arith.constant 0 : index
    %15 = vector.load %arg7[%c0_11, %c0_12] : memref<8x1xf32, #tpu.memory_space<vmem>>, vector<8x1xf32>
    %16 = vector.broadcast %15 : vector<8x1xf32> to vector<8x128xf32>
    %17 = arith.addf %14, %16 : vector<8x128xf32>
    %18 = arith.addf %8, %17 : vector<8x128xf32>
    %c0_13 = arith.constant 0 : index
    %c0_14 = arith.constant 0 : index
    %c0_15 = arith.constant 0 : index
    %19 = vector.load %arg8[%c0_13, %c0_14, %c0_15] : memref<1x8x128xf32, #tpu.memory_space<vmem>>, vector<1x8x128xf32>
    %20 = vector.shape_cast %19 : vector<1x8x128xf32> to vector<8x128xf32>
    %21 = vector.shape_cast %18 : vector<8x128xf32> to vector<1x8x128xf32>
    tpu.vector_store %arg8[%c0_13, %c0_14, %c0_15], %21 {strides = array<i32>} : memref<1x8x128xf32, #tpu.memory_space<vmem>>, vector<1x8x128xf32>,
    return
  }
  func.func @transform_0(%arg0: i32, %arg1: i32) -> (i32, i32, i32) {
    %c0_i32 = arith.constant 0 : i32
    %c0_i32_0 = arith.constant 0 : i32
    return %arg0, %c0_i32, %arg1 : i32, i32, i32
  }
  func.func @transform_1(%arg0: i32, %arg1: i32) -> (i32, i32) {
    %c0_i32 = arith.constant 0 : i32
    %c0_i32_0 = arith.constant 0 : i32
    %c0_i32_1 = arith.constant 0 : i32
    return %c0_i32, %c0_i32_0 : i32, i32
  }
  func.func @transform_2(%arg0: i32, %arg1: i32) -> (i32, i32) {
    %c0_i32 = arith.constant 0 : i32
    %c0_i32_0 = arith.constant 0 : i32
    %c0_i32_1 = arith.constant 0 : i32
    return %c0_i32, %c0_i32_0 : i32, i32
  }
  func.func @transform_3(%arg0: i32, %arg1: i32) -> (i32, i32, i32) {
    %c0_i32 = arith.constant 0 : i32
    %c0_i32_0 = arith.constant 0 : i32
    return %arg0, %c0_i32, %arg1 : i32, i32, i32
  }
  func.func @transform_4(%arg0: i32, %arg1: i32) -> (i32, i32) {
    %c0_i32 = arith.constant 0 : i32
    %c0_i32_0 = arith.constant 0 : i32
    %c0_i32_1 = arith.constant 0 : i32
    return %c0_i32, %c0_i32_0 : i32, i32
  }
  func.func @transform_5(%arg0: i32, %arg1: i32) -> (i32, i32) {
    %c0_i32 = arith.constant 0 : i32
    %c0_i32_0 = arith.constant 0 : i32
    %c0_i32_1 = arith.constant 0 : i32
    return %c0_i32, %c0_i32_0 : i32, i32
  }
  func.func @transform_6(%arg0: i32, %arg1: i32) -> (i32, i32, i32) {
    %c0_i32 = arith.constant 0 : i32
    %c0_i32_0 = arith.constant 0 : i32
    return %arg0, %c0_i32, %arg1 : i32, i32, i32
  }
}

</mosaic_0001>

<bundles_post_ra>
// kernel: inverted_residual.7
= control target key start
LH: loop header
LB: loop body
LE: loop exit
PB: predicated region body
PF: predicated region fallthrough
CT: control target
= control target key end

     0   :  { %s584_s21 = smov 0   ;;  %s586_s22 = smov 0   ;;  %s654_s0 = inlined_call_operand.vmem [shape: bf16[2,8,256], index: 0, kind: input, shape index: {}]   ;;  %s655_s1 = inlined_call_operand.vmem [shape: f32[8,1], index: 1, kind: input, shape index: {}]   ;;  %s656_s2 = inlined_call_operand.vmem [shape: f32[8,1], index: 2, kind: input, shape index: {}]   ;;  %s657_s3 = inlined_call_operand.vmem [shape: bf16[2,8,256], index: 3, kind: input, shape index: {}]   ;;  %s658_s4 = inlined_call_operand.vmem [shape: f32[8,1], index: 4, kind: input, shape index: {}]   ;;  %s659_s5 = inlined_call_operand.vmem [shape: f32[8,1], index: 5, kind: input, shape index: {}]   ;;  %s660_s6 = inlined_call_operand.vmem [shape: f32[2,8,256], index: 6, kind: output, shape index: {}]  }
   0x1   :  { %s588_s23 = smov 0   ;;  %s590_s24 = smov 0  }
   0x2   :  { %s592_s25 = smov 0  }
   0x3 LB: > { %s25_s26 = sadd.s32 1, %s538_s23  ;;  %s28_s27 = sadd.s32 1, %s542_s24  ;;  %s546_s25 = sphi %s592_s25, %s16_s25   ;;  %s542_s24 = sphi %s590_s24, %s664_s24   ;;  %s538_s23 = sphi %s588_s23, %s663_s23   ;;  %s534_s22 = sphi %s586_s22, %s662_s22   ;;  %s530_s21 = sphi %s584_s21, %s661_s21  }
   0x4   : > { %p26_p0 = scmp.ge.s32.totalorder %s25_s26, 2  ;;  %p456_p1 = scmp.ge.s32.totalorder %s546_s25, 1 }
   0x5   : > { %p246_p2 = scmp.lt.s32.totalorder %s546_s25, 5 }
   0x6   : > { %s666_s26 = smov (%p26_p0, %s25_s26), 0  ;;  %s668_s27 = smov (!%p26_p0, %s28_s27), %s542_s24 }
   0x7   : > { %p247_p3 = pnand %p456_p1, %p246_p2  ;;  %p30_p4 = scmp.ge.s32.totalorder %s668_s27, 2 }
   0x8   : > { %p290_p5 = scmp.lt.s32.totalorder (!%p247_p3), %s534_s22, 1  ;;  %p292_p6 = scmp.lt.s32.totalorder (!%p247_p3), %s530_s21, 1 }
   0x9   : > { %s670_s27 = smov (%p30_p4, %s668_s27), 0  ;;  %250 = sbr.rel (%p247_p3) target bundleno = 146 (0x92), region = 44 }
   0xe   : > { %v323_v0 = vld [vmem:[%s656_s2] sm:$0xff]  ;;  %v548_v2 = vmov 0   ;;  %s672_s22 = smov (!%p290_p5, %s534_s22), 1  ;;  %s674_s21 = smov (!%p292_p6, %s530_s21), 1 }
   0xf   : > { %v316_v1 = vld [vmem:[%s655_s1] sm:$0xff]  ;;  %507 = vset.pattern.permute.xlu1 %v548_v2  ;;  %506 = vset.pattern.permute.xlu0 %v548_v2  ;;  %s457_s12 = sshll.u32 %s672_s22, 1 }
  0x10   : > { %326 = vperm.xlu1 %507, %v323_v0   ;;  %319 = vperm.xlu0 %506, %v316_v1   ;;  %v339_v3 = vld [vmem:[%s659_s5] sm:$0xff]  ;;  %s295_s13 = sadd.s32 %s457_s12, %s674_s21 }
  0x11   : > { %v332_v4 = vld [vmem:[%s658_s4] sm:$0xff]  ;;  %s458_s14 = sshll.u32 %s295_s13, 2  ;;  %s462_s28 = sshll.u32 %s295_s13, 3 }
  0x12   : > { %s297_s17 = scalar_lea.vmem %s654_s0, %s458_s14  ;;  %s305_s20 = scalar_lea.vmem %s657_s3, %s458_s14 }
  0x13   : > { %v314_v7 = vld [vmem:[%s297_s17] sm:$0xf]  ;;  %s313_s29 = scalar_lea.vmem %s660_s6, %s462_s28 }
  0x14   : > { %v330_v8 = vld [vmem:[%s305_s20] sm:$0xf]  ;;  %v315_v9 = vunpack.c.l.bf16 %v314_v7 }
  0x15   : > { %v331_v10 = vunpack.c.l.bf16 %v330_v8 }
  0x18   : > { %342 = vperm.xlu1 %507, %v339_v3   ;;  %335 = vperm.xlu0 %506, %v332_v4  }
  0x82   : > { %v327_v5 = vpop.permute.xlu1 %326  ;;  %v320_v6 = vpop.permute.xlu0 %319 }
  0x83   : > { %v322_v11 = vmul.f32 %v320_v6, %v315_v9 }
  0x85   : > { %v329_v15 = vadd.f32 %v327_v5, %v322_v11 }
  0x8a   : > { %v336_v12 = vpop.permute.xlu0 %335  ;;  %v343_v14 = vpop.permute.xlu1 %342 }
  0x8b   : > { %v338_v13 = vmul.f32 %v336_v12, %v331_v10 }
  0x8d   : > { %v345_v16 = vadd.f32 %v343_v14, %v338_v13 }
  0x8f   : > { %v346_v17 = vadd.f32 %v345_v16, %v329_v15 }
  0x91   : > { %347 = vst [vmem:[%s313_s29] sm:$0xff] %v346_v17 }
  0x92 PF: > { %s16_s25 = sadd.s32 1, %s546_s25   ;;  %s661_s21 = smov %s538_s23 }
  0x93   : > { %p13_p7 = scmp.ge.s32.totalorder %s16_s25, 6   ;;  %s662_s22 = smov %s542_s24 }
  0x94   : > { %s663_s23 = smov %s666_s26  ;;  %s664_s24 = smov %s670_s27 }
  0x95   :  { %15 = sbr.rel (!%p13_p7) target bundleno = 3 (0x3), region = 77 }

// kernel: inverted_residual.4
= control target key start
LH: loop header
LB: loop body
LE: loop exit
PB: predicated region body
PF: predicated region fallthrough
CT: control target
= control target key end

     0   :  { %s889_s21 = smov 0   ;;  %s891_s22 = smov 0   ;;  %s1016_s0 = inlined_call_operand.vmem [shape: f32[2,4,256], index: 0, kind: input, shape index: {}]   ;;  %s1017_s1 = inlined_call_operand.vmem [shape: bf16[24,4], index: 1, kind: input, shape index: {}]   ;;  %s1018_s2 = inlined_call_operand.vmem [shape: bf16[8,4], index: 2, kind: input, shape index: {}]   ;;  %s1019_s3 = inlined_call_operand.vmem [shape: bf16[2,24,256], index: 3, kind: output, shape index: {0}]   ;;  %s1020_s4 = inlined_call_operand.vmem [shape: bf16[2,8,256], index: 4, kind: output, shape index: {1}]   ;;  %s1021_s5 = inlined_call_operand.vmem [shape: f32[2,2,24,2], index: 5, kind: output, shape index: {2}]   ;;  %s1022_s6 = inlined_call_operand.vmem [shape: f32[2,2,8,2], index: 6, kind: output, shape index: {3}]  }
   0x1   :  { %s893_s23 = smov 0   ;;  %s895_s24 = smov 0  }
   0x2   :  { %s897_s25 = smov 0   ;;  %s899_s26 = smov 0  }
   0x3   :  { %s901_s27 = smov 0  }
   0x4 LB: > { %s26_s28 = sadd.s32 1, %s844_s25  ;;  %s29_s29 = sadd.s32 1, %s848_s26  ;;  %s852_s27 = sphi %s901_s27, %s17_s27   ;;  %s848_s26 = sphi %s899_s26, %s1029_s26   ;;  %s844_s25 = sphi %s897_s25, %s1028_s25   ;;  %s840_s24 = sphi %s895_s24, %s1027_s24   ;;  %s836_s23 = sphi %s893_s23, %s1026_s23   ;;  %s832_s22 = sphi %s891_s22, %s1025_s22   ;;  %s828_s21 = sphi %s889_s21, %s1024_s21  }
   0x5   : > { %p27_p0 = scmp.ge.s32.totalorder %s26_s28, 2  ;;  %s709_s30 = sadd.s32 4294967295, %s852_s27  }
   0x6   : > { %p118_p1 = scmp.ne.s32.totalorder %s832_s22, %s828_s21  ;;  %p119_p2 = scmp.eq.s32.totalorder %s709_s30, 3 }
   0x7   : > { %s1031_s28 = smov (%p27_p0, %s26_s28), 0  ;;  %s1033_s29 = smov (!%p27_p0, %s29_s29), %s848_s26 }
   0x8   : > { %s104_s7 = ssub.s32 %s844_s25, %s1031_s28  ;;  %p31_p3 = scmp.ge.s32.totalorder %s1033_s29, 2 }
   0x9   : > { %p713_p4 = scmp.ge.s32.totalorder %s852_s27, 1  ;;  %p935_p5 = por %p119_p2, %p118_p1 }
   0xa   : > { %p244_p6 = scmp.lt.s32.totalorder %s852_s27, 5  ;;  %s1035_s29 = smov (%p31_p3, %s1033_s29), 0 }
   0xb   : > { %s103_s9 = ssub.s32 %s848_s26, %s1035_s29  ;;  %s108_s11 = sadd.s32 1, %s832_s22 }
   0xc   : > { %p245_p7 = pnand %p713_p4, %p244_p6  ;;  %s105_s10 = sor.u32 %s104_s7, %s103_s9 }
   0xd   : > { %p106_p8 = scmp.eq.s32.totalorder %s105_s10, 0  ;;  %p301_p9 = scmp.lt.s32.totalorder (!%p245_p7), %s840_s24, 1 }
   0xe   : > { %248 = sbr.rel (%p245_p7) target bundleno = 292 (0x124), region = 32  ;;  %p303_p10 = scmp.lt.s32.totalorder (!%p245_p7), %s836_s23, 1 }
   0xf   : > { %s946_s12 = scalar_select %p106_p8, %s832_s22, %s108_s11  }
  0x10   : > { %s267_s30 = sand.u32 (!%p245_p7), 1, %s828_s21  }
  0x11   : > { %s738_s11 = smul.u32 (!%p245_p7), 12, %s267_s30 }
  0x13   : > { %s302_s13 = scalar_select %p301_p9, %s840_s24, 1  ;;  %v339_v0 = vld [vmem:[%s1017_s1 + $0x8] sm:$0xf]  ;;  %vm355_vm0 = vcmask 1041408   ;;  %v731_v5 = vld [vmem:[%s1017_s1] sm:$0xff]  ;;  %vm348_vm1 = vcmask 31744  }
  0x14   : > { %s304_s14 = scalar_select %p303_p10, %s836_s23, 1  ;;  %v345_v1 = vunpack.c.l.b16 %v339_v0  ;;  %v406_v7 = vld [vmem:[%s1018_s2] sm:$0xf]  ;;  %vm389_vm2 = vcmask 7168   ;;  %vm402_vm3 = vcmask 15368  }
  0x15   : > { %s714_s15 = sshll.u32 %s302_s13, 1  ;;  %s740_s16 = smul.u32 6, %s302_s13 }
  0x16   : > { %s955_s18 = sadd.s32 %s714_s15, %s304_s14  ;;  %v347_v6 = vpack.c.b16 %v345_v1, %v345_v1  ;;  %s739_s17 = smul.u32 3, %s304_s14 }
  0x17   : > { %s715_s19 = sshll.u32 %s955_s18, 2  ;;  %s973_s21 = scalar_lea.vmem [#allocation2], %s738_s11 }
  0x18   : > { %s308_s7 = scalar_lea.vmem %s1016_s0, %s715_s19  ;;  %s967_s20 = sadd.s32 %s740_s16, %s739_s17 }
  0x19   : > { %v335_v2 = vld [vmem:[%s308_s7] sm:$0xf]  ;;  %s316_s10 = scalar_lea.vmem %s1020_s4, %s715_s19  ;;  %s718_s13 = sshll.u32 %s967_s20, 3 }
  0x1a   : > { %v336_v3 = vpack.c.bf16 %v335_v2, %v335_v2  ;;  %s720_s14 = sshll.u32 %s955_s18, 3  ;;  %s325_s16 = scalar_lea.vmem %s1021_s5, %s718_s13 }
  0x1b   : > { %s333_s7 = scalar_lea.vmem %s1022_s6, %s720_s14  ;;  %s741_s18 = smul.u32 (%p935_p5), 6, %s840_s24 }
  0x1c   : > { %v357_v4 = vsel %vm355_vm0, %v336_v3, 0 }
  0x1d   : > { %366 = vmatpush.bf16.msra.mxu0 %v357_v4  ;;  %737 = vmatpush.bf16.msra.mxu2 %v357_v4  ;;  %s465_s20 = sadd.s32 (%p935_p5), %s836_s23, %s741_s18 }
  0x1e   : > { %417 = vmatpush.bf16.msra.mxu1 %v357_v4  ;;  %s728_s9 = sshll.u32 (%p935_p5), %s465_s20, 2 }
  0x1f   : > { %s467_s13 = scalar_lea.vmem (%p935_p5), %s1019_s3, %s728_s9 }
  0x20   : > { %725 = vmatmul.msk.bf16.vlgmr.msra.gmra.mxu0 %vm348_vm1, %v731_v5  ;;  %726 = vmatmul.msk.bf16.vlgmr.msra.gmra.mxu2 %vm348_vm1, %v347_v6 }
  0x21   : > { %727 = vmatmul.msk.bf16.vlgmr.msra.gmra.mxu1 %vm348_vm1, %v406_v7 }
  0x9d   : > { %v368_v8 = vpop.f32.mrf.mxu0 }
  0x9e   : > { %v419_v9 = vpop.f32.mrf.mxu1  ;;  %383 = vadd.xlane.f32.xlu0 %v368_v8  ;;  %v393_v10 = vmul.f32 %v368_v8, %v368_v8 }
  0x9f   : > { %v423_v11 = vpack.c.bf16 %v419_v9, %v419_v9  ;;  %425 = vadd.xlane.f32.xlu1 %v419_v9  ;;  %v428_v20 = vmul.f32 %v419_v9, %v419_v9 }
  0xa0   : > { %396 = vadd.xlane.f32.xlu2 %v393_v10 }
  0xa1   : > { %424 = vst [vmem:[%s316_s10] sm:$0xf] %v423_v11 }
  0xa3   : > { %v373_v12 = vpop.f32.mrf.mxu2 }
  0xa4   : > { %v379_v13 = vpack.c.bf16 %v373_v12, %v373_v12  ;;  %v395_v19 = vmul.f32 %v373_v12, %v373_v12 }
  0xa5   : > { %v370_v14 = vpop.f32.mrf.mxu0 }
  0xa6   : > { %v735_v15 = vpack.c.bf16 %v370_v14, %v368_v8  ;;  %382 = vst [vmem:[%s973_s21 + $0x8] sm:$0xf] %v379_v13  ;;  %v421_v16 = vpop.f32.mrf.mxu1  ;;  %385 = vadd.xlane.f32.xlu0 %v370_v14  ;;  %v394_v17 = vmul.f32 %v370_v14, %v370_v14 }
  0xa7   : > { %387 = vadd.xlane.f32.xlu1 %v373_v12 }
  0xa8   : > { %736 = vst [vmem:[%s973_s21] sm:$0xff] %v735_v15   ;;  %398 = vadd.xlane.f32.xlu2 %v394_v17 }
  0xab   : > { %v375_v18 = vpop.f32.mrf.mxu2 }
  0xad   : > { %v488_v31 = vld [vmem:[%s973_s21 + $0x8] sm:$0xf] (%p935_p5) }
  0xae   : > { %400 = vadd.xlane.f32.xlu0 %v395_v19  ;;  %489 = vst [vmem:[%s467_s13 + $0x10] sm:$0xf] (%p935_p5), %v488_v31 }
  0xaf   : > { %429 = vadd.xlane.f32.xlu1 %v428_v20  ;;  %v484_v29 = vld [vmem:[%s973_s21] sm:$0xf] (%p935_p5)  ;;  %v486_v30 = vld [vmem:[%s973_s21 + $0x4] sm:$0xf] (%p935_p5) }
  0xb0   : > { %485 = vst [vmem:[%s467_s13] sm:$0xf] (%p935_p5), %v484_v29 }
  0xb1   : > { %487 = vst [vmem:[%s467_s13 + $0x8] sm:$0xf] (%p935_p5), %v486_v30 }
 0x111   : > { %v384_v21 = vpop.xlane.xlu0 %383 }
 0x112   : > { %v426_v22 = vpop.xlane.xlu1 %425  ;;  %390 = vst.msk [vmem:[%s325_s16] sm:$0xff] %vm389_vm2, %v384_v21 }
 0x113   : > { %427 = vst.msk [vmem:[%s333_s7] sm:$0xff] %vm389_vm2, %v426_v22  ;;  %v397_v23 = vpop.xlane.xlu2 %396 }
 0x114   : > { %403 = vst.msk [vmem:[%s325_s16] sm:$0xff] %vm402_vm3, %v397_v23 }
 0x119   : > { %v386_v24 = vpop.xlane.xlu0 %385 }
 0x11a   : > { %v388_v25 = vpop.xlane.xlu1 %387  ;;  %391 = vst.msk [vmem:[%s325_s16 + $0x8] sm:$0xff] %vm389_vm2, %v386_v24 }
 0x11b   : > { %392 = vst.msk [vmem:[%s325_s16 + $0x10] sm:$0xff] %vm389_vm2, %v388_v25  ;;  %v399_v26 = vpop.xlane.xlu2 %398 }
 0x11c   : > { %404 = vst.msk [vmem:[%s325_s16 + $0x8] sm:$0xff] %vm402_vm3, %v399_v26 }
 0x11f   : > { %463 = sbr.rel (!%p935_p5) target bundleno = 292 (0x124), region = 36 }
 0x121   : > { %v401_v27 = vpop.xlane.xlu0 %400 }
 0x122   : > { %v430_v28 = vpop.xlane.xlu1 %429  ;;  %405 = vst.msk [vmem:[%s325_s16 + $0x10] sm:$0xff] %vm402_vm3, %v401_v27 }
 0x123   : > { %431 = vst.msk [vmem:[%s333_s7] sm:$0xff] %vm402_vm3, %v430_v28 }
 0x124 PF: > { %s17_s27 = sadd.s32 1, %s852_s27   ;;  %s1024_s21 = smov %s832_s22 }
 0x125   : > { %p14_p11 = scmp.ge.s32.totalorder %s17_s27, 6   ;;  %s1025_s22 = smov %s946_s12 }
 0x126   : > { %s1026_s23 = smov %s844_s25  ;;  %s1027_s24 = smov %s848_s26 }
 0x127   : > { %s1028_s25 = smov %s1031_s28  ;;  %s1029_s26 = smov %s1035_s29 }
 0x128   :  { %16 = sbr.rel (!%p14_p11) target bundleno = 4 (0x4), region = 139 }

// kernel: inverted_residual.6
= control target key start
LH: loop header
LB: loop body
LE: loop exit
PB: predicated region body
PF: predicated region fallthrough
CT: control target
= control target key end

     0   :  { %s713_s18 = smov 0   ;;  %s715_s19 = smov 0   ;;  %s828_s0 = inlined_call_operand.vmem [shape: bf16[2,24,256], index: 0, kind: input, shape index: {}]   ;;  %s829_s1 = inlined_call_operand.vmem [shape: f32[24,1], index: 1, kind: input, shape index: {}]   ;;  %s830_s2 = inlined_call_operand.vmem [shape: f32[24,1], index: 2, kind: input, shape index: {}]   ;;  %s831_s3 = inlined_call_operand.vmem [shape: bf16[8,24], index: 3, kind: input, shape index: {}]   ;;  %s832_s4 = inlined_call_operand.vmem [shape: bf16[2,8,256], index: 4, kind: output, shape index: {0}]   ;;  %s833_s5 = inlined_call_operand.vmem [shape: f32[2,2,8,2], index: 5, kind: output, shape index: {1}]  }
   0x1   :  { %s717_s20 = smov 0   ;;  %s719_s21 = smov 0  }
   0x2   :  { %s721_s22 = smov 0   ;;  %s723_s23 = smov 0  }
   0x3   :  { %s725_s24 = smov 0  }
   0x4 LB: > { %s25_s25 = sadd.s32 1, %s672_s22  ;;  %s28_s26 = sadd.s32 1, %s676_s23  ;;  %s680_s24 = sphi %s725_s24, %s16_s24   ;;  %s676_s23 = sphi %s723_s23, %s839_s23   ;;  %s672_s22 = sphi %s721_s22, %s838_s22   ;;  %s668_s21 = sphi %s719_s21, %s837_s21   ;;  %s664_s20 = sphi %s717_s20, %s836_s20   ;;  %s660_s19 = sphi %s715_s19, %s835_s19   ;;  %s656_s18 = sphi %s713_s18, %s834_s18  }
   0x5   : > { %p26_p0 = scmp.ge.s32.totalorder %s25_s25, 2  ;;  %p44_p1 = scmp.ne.s32.totalorder %s660_s19, %s656_s18 }
   0x6   : > { %p45_p2 = scmp.eq.s32.totalorder %s680_s24, 0  ;;  %s37_s30 = sadd.s32 1, %s660_s19 }
   0x7   : > { %s841_s25 = smov (%p26_p0, %s25_s25), 0  ;;  %s843_s26 = smov (!%p26_p0, %s28_s26), %s676_s23 }
   0x8   : > { %p46_p3 = por %p45_p2, %p44_p1  ;;  %p30_p4 = scmp.ge.s32.totalorder %s843_s26, 2 }
   0x9   : > { %s33_s27 = ssub.s32 %s672_s22, %s841_s25  ;;  %p549_p6 = scmp.ge.s32.totalorder %s680_s24, 4 }
   0xa   : > { %s845_s26 = smov (%p30_p4, %s843_s26), 0 }
   0xb   : > { %s32_s28 = ssub.s32 %s676_s23, %s845_s26  ;;  %198 = sbr.rel (%p549_p6) target bundleno = 26 (0x1a), region = 28 }
   0xc   : > { %s34_s29 = sor.u32 %s33_s27, %s32_s28 }
   0xd   : > { %p35_p5 = scmp.eq.s32.totalorder %s34_s29, 0 }
   0xf   : > { %s764_s6 = scalar_select %p35_p5, %s660_s19, %s37_s30  }
  0x10   : > { %201 = sbr.rel (!%p46_p3) target bundleno = 26 (0x1a), region = 32  ;;  %s203_s7 = sand.u32 (%p46_p3), 1, %s660_s19  }
  0x11   : > { %s564_s8 = smul.u32 (%p46_p3), 6, %s676_s23 }
  0x12   : > { %s563_s9 = smul.u32 (%p46_p3), 12, %s203_s7 }
  0x13   : > { %s207_s10 = sadd.s32 (%p46_p3), %s672_s22, %s564_s8 }
  0x14   : > { %s550_s11 = sshll.u32 (%p46_p3), %s207_s10, 2  ;;  %s205_s15 = scalar_lea.vmem (%p46_p3), [#allocation2], %s563_s9 }
  0x15   : > { %s209_s14 = scalar_lea.vmem %s828_s0, %s550_s11 }
  0x16   : > { %v226_v0 = vld [vmem:[%s209_s14] sm:$0xf]  ;;  %v228_v1 = vld [vmem:[%s209_s14 + $0x8] sm:$0xf]  ;;  %v230_v2 = vld [vmem:[%s209_s14 + $0x10] sm:$0xf] }
  0x17   : > { %227 = vst [vmem:[%s205_s15] sm:$0xf] %v226_v0 }
  0x18   : > { %229 = vst [vmem:[%s205_s15 + $0x4] sm:$0xf] %v228_v1 }
  0x19   : > { %231 = vst [vmem:[%s205_s15 + $0x8] sm:$0xf] %v230_v2 }
  0x1a PF: > { %p551_p7 = scmp.ge.s32.totalorder %s680_s24, 1  ;;  %p260_p8 = scmp.lt.s32.totalorder %s680_s24, 5 }
  0x1c   : > { %p261_p9 = pnand %p551_p7, %p260_p8 }
  0x1d   : > { %s267_s13 = sand.u32 (!%p261_p9), 1, %s656_s18   ;;  %p305_p10 = scmp.lt.s32.totalorder (!%p261_p9), %s668_s21, 1 }
  0x1e   : > { %264 = sbr.rel (%p261_p9) target bundleno = 421 (0x1a5), region = 73  ;;  %p307_p11 = scmp.lt.s32.totalorder (!%p261_p9), %s664_s20, 1 }
  0x1f   : > { %s565_s14 = smul.u32 (!%p261_p9), 12, %s267_s13 }
  0x21   : > { %s269_s15 = scalar_lea.vmem (!%p261_p9), [#allocation2], %s565_s14 }
  0x23   : > { %v330_v3 = vld [vmem:[%s829_s1 + $0x10] sm:$0xff]  ;;  %v328_v4 = vld [vmem:[%s829_s1] sm:$0xff]  ;;  %v682_v5 = vmov 0   ;;  %v329_v8 = vld [vmem:[%s829_s1 + $0x8] sm:$0xff]  ;;  %vm383_vm0 = vcmask 1043456   ;;  %vm379_vm1 = vcmask 195584  }
  0x24   : > { %624 = vset.pattern.permute.xlu1 %v682_v5  ;;  %623 = vset.pattern.permute.xlu0 %v682_v5  ;;  %v349_v6 = vld [vmem:[%s830_s2] sm:$0xff]  ;;  %v351_v7 = vld [vmem:[%s830_s2 + $0x10] sm:$0xff]  ;;  %v350_v9 = vld [vmem:[%s830_s2 + $0x8] sm:$0xff]  ;;  %s847_s21 = smov (!%p305_p10, %s668_s21), 1  ;;  %s849_s20 = smov (!%p307_p11, %s664_s20), 1  ;;  %vm404_vm2 = vcmask 7168  }
  0x25   : > { %343 = vperm.xlu0 %623, %v330_v3   ;;  %333 = vperm.xlu1 %624, %v328_v4   ;;  %v560_v11 = vld [vmem:[%s269_s15] sm:$0xff]   ;;  %v324_v13 = vld [vmem:[%s269_s15 + $0x8] sm:$0xf]  ;;  %s552_s17 = sshll.u32 %s847_s21, 1  ;;  %vm409_vm3 = vcmask 15368  }
  0x26   : > { %625 = vset.pattern.permute.xlu2 %v682_v5  ;;  %v561_v15 = vunpack.c.l.bf16 %v560_v11  ;;  %v327_v16 = vunpack.c.l.bf16 %v324_v13  ;;  %v562_v17 = vunpack.c.h.bf16 %v560_v11  ;;  %v376_v36 = vld [vmem:[%s831_s3] sm:$0xf]  ;;  %s310_s27 = sadd.s32 %s552_s17, %s849_s20 }
  0x27   : > { %354 = vperm.xlu2 %625, %v349_v6   ;;  %s553_s28 = sshll.u32 %s310_s27, 2  ;;  %s555_s8 = sshll.u32 %s310_s27, 3 }
  0x28   : > { %s312_s7 = scalar_lea.vmem %s832_s4, %s553_s28  ;;  %s320_s11 = scalar_lea.vmem %s833_s5, %s555_s8 }
  0x2d   : > { %364 = vperm.xlu0 %623, %v351_v7   ;;  %338 = vperm.xlu1 %624, %v329_v8  }
  0x2f   : > { %359 = vperm.xlu2 %625, %v350_v9  }
  0x81   : > { %v355_v10 = vpop.permute.xlu2 %354 }
  0x89   : > { %v360_v25 = vpop.permute.xlu2 %359 }
  0x97   : > { %v344_v12 = vpop.permute.xlu0 %343  ;;  %v334_v14 = vpop.permute.xlu1 %333 }
  0x98   : > { %v346_v18 = vmul.f32 %v561_v15, %v334_v14  ;;  %v348_v19 = vmul.f32 %v344_v12, %v327_v16 }
  0x9a   : > { %v367_v24 = vadd.f32 %v355_v10, %v346_v18 }
  0x9c   : > { %v370_v30 = vmax.f32 %v367_v24, 0.0 }
  0x9e   : > { %v373_v34 = vmin.f32 %v370_v30, 6.0 }
  0x9f   : > { %v365_v20 = vpop.permute.xlu0 %364  ;;  %v339_v21 = vpop.permute.xlu1 %338 }
  0xa0   : > { %v369_v22 = vadd.f32 %v365_v20, %v348_v19  ;;  %v347_v23 = vmul.f32 %v562_v17, %v339_v21 }
  0xa2   : > { %v372_v26 = vmax.f32 %v369_v22, 0.0  ;;  %v368_v27 = vadd.f32 %v360_v25, %v347_v23 }
  0xa4   : > { %v375_v28 = vmin.f32 %v372_v26, 6.0  ;;  %v371_v29 = vmax.f32 %v368_v27, 0.0 }
  0xa6   : > { %v378_v31 = vpack.c.bf16 %v375_v28, %v375_v28  ;;  %v374_v32 = vmin.f32 %v371_v29, 6.0 }
  0xa8   : > { %v385_v33 = vsel %vm383_vm0, %v378_v31, 0  ;;  %v377_v35 = vpack.c.bf16 %v374_v32, %v373_v34 }
  0xa9   : > { %393 = vmatpush.bf16.msra.mxu0 %v385_v33 }
  0xad   : > { %394 = vmatpush.bf16.msra.mxu0 %v377_v35 }
  0xb0   : > { %556 = vmatmul.msk.bf16.vlgmr.msra.gmra.mxu0 %vm379_vm1, %v376_v36 }
 0x12d   : > { %v396_v37 = vpop.f32.mrf.mxu0 }
 0x12e   : > { %v400_v38 = vpack.c.bf16 %v396_v37, %v396_v37  ;;  %402 = vadd.xlane.f32.xlu0 %v396_v37  ;;  %v406_v39 = vmul.f32 %v396_v37, %v396_v37 }
 0x130   : > { %407 = vadd.xlane.f32.xlu1 %v406_v39  ;;  %401 = vst [vmem:[%s312_s7] sm:$0xf] %v400_v38 }
 0x135   : > { %v398_v40 = vpop.f32.mrf.mxu0 }
 0x1a1   : > { %v403_v41 = vpop.xlane.xlu0 %402 }
 0x1a2   : > { %405 = vst.msk [vmem:[%s320_s11] sm:$0xff] %vm404_vm2, %v403_v41 }
 0x1a3   : > { %v408_v42 = vpop.xlane.xlu1 %407 }
 0x1a4   : > { %410 = vst.msk [vmem:[%s320_s11] sm:$0xff] %vm409_vm3, %v408_v42 }
 0x1a5 PF: > { %s16_s24 = sadd.s32 1, %s680_s24   ;;  %s834_s18 = smov %s660_s19 }
 0x1a6   : > { %p13_p12 = scmp.ge.s32.totalorder %s16_s24, 6   ;;  %s835_s19 = smov %s764_s6 }
 0x1a7   : > { %s836_s20 = smov %s672_s22  ;;  %s837_s21 = smov %s676_s23 }
 0x1a8   : > { %s838_s22 = smov %s841_s25  ;;  %s839_s23 = smov %s845_s26 }
 0x1a9   :  { %15 = sbr.rel (!%p13_p12) target bundleno = 4 (0x4), region = 124 }

// kernel: inverted_residual.5
= control target key start
LH: loop header
LB: loop body
LE: loop exit
PB: predicated region body
PF: predicated region fallthrough
CT: control target
= control target key end

     0   :  { %s952_s21 = smov 0   ;;  %s954_s22 = smov 0   ;;  %s1122_s0 = inlined_call_operand.vmem [shape: bf16[2,24,256], index: 0, kind: input, shape index: {}]   ;;  %s1123_s1 = inlined_call_operand.vmem [shape: f32[24,9], index: 1, kind: input, shape index: {}]   ;;  %s1124_s2 = inlined_call_operand.vmem [shape: f32[24,1], index: 2, kind: input, shape index: {}]   ;;  %s1125_s3 = inlined_call_operand.vmem [shape: f32[24,1], index: 3, kind: input, shape index: {}]   ;;  %s1126_s4 = inlined_call_operand.vmem [shape: f32[4,256], index: 4, kind: input, shape index: {}]   ;;  %s1127_s5 = inlined_call_operand.vmem [shape: bf16[2,24,256], index: 5, kind: output, shape index: {0}]   ;;  %s1128_s6 = inlined_call_operand.vmem [shape: f32[2,3,8,2], index: 6, kind: output, shape index: {1}]  }
   0x1   :  { %s956_s23 = smov 0   ;;  %s958_s24 = smov 0  }
   0x2   :  { %s960_s25 = smov 0  }
   0x3 LB: > { %s26_s26 = sadd.s32 1, %s890_s23  ;;  %s29_s27 = sadd.s32 1, %s894_s24  ;;  %s898_s25 = sphi %s960_s25, %s17_s25   ;;  %s894_s24 = sphi %s958_s24, %s1132_s24   ;;  %s890_s23 = sphi %s956_s23, %s1131_s23   ;;  %s886_s22 = sphi %s954_s22, %s1130_s22   ;;  %s882_s21 = sphi %s952_s21, %s1129_s21  }
   0x4   : > { %p27_p0 = scmp.ge.s32.totalorder %s26_s26, 3  ;;  %p776_p1 = scmp.ge.s32.totalorder %s898_s25, 1 }
   0x5   : > { %p264_p2 = scmp.lt.s32.totalorder %s898_s25, 7 }
   0x6   : > { %s1134_s26 = smov (%p27_p0, %s26_s26), 0  ;;  %s1136_s27 = smov (!%p27_p0, %s29_s27), %s894_s24 }
   0x7   : > { %p265_p3 = pnand %p776_p1, %p264_p2  ;;  %p31_p4 = scmp.ge.s32.totalorder %s1136_s27, 2 }
   0x8   : > { %p324_p5 = scmp.lt.s32.totalorder (!%p265_p3), %s882_s21, 2  ;;  %p322_p6 = scmp.lt.s32.totalorder (!%p265_p3), %s886_s22, 1 }
   0x9   : > { %s1138_s27 = smov (%p31_p4, %s1136_s27), 0  ;;  %268 = sbr.rel (%p265_p3) target bundleno = 438 (0x1b6), region = 40 }
   0xa   : > { %s907_s29 = smov (!%p265_p3), 16   ;;  %s909_s30 = smov (!%p265_p3), 15  }
   0xb   : > { %s912_s8 = smov (!%p265_p3), 127   ;;  %s914_s9 = smov (!%p265_p3), 113  }
   0xc   : > { %s916_s11 = smov (!%p265_p3), 111  }
   0xe   : > { %v900_v0 = vmov 0   ;;  %v901_v1 = vmov 4   ;;  %s1140_s21 = smov (!%p324_p5, %s882_s21), 2  ;;  %v902_v5 = vmov 1   ;;  %v903_v6 = vmov 2   ;;  %s1142_s22 = smov (!%p322_p6, %s886_s22), 1 }
   0xf   : > { %849 = vset.pattern.permute.xlu0 %v900_v0  ;;  %850 = vset.pattern.permute.xlu1 %v901_v1  ;;  %s779_s28 = sshll.u32 %s1140_s21, 3  ;;  %v904_v7 = vmov 3   ;;  %v905_v8 = vmov 5   ;;  %s790_s14 = smul.u32 6, %s1142_s22  ;;  %v908_v22 = vmov 6   ;;  %v911_v23 = vmov 8  }
  0x10   : > { %851 = vset.pattern.permute.xlu2 %v900_v0  ;;  %s338_s7 = scalar_lea.vmem %s1124_s2, %s779_s28  ;;  %s334_s10 = scalar_lea.vmem %s1123_s1, %s779_s28  ;;  %v913_v24 = vmov 7   ;;  %v402_v37 = vlaneseq  ;;  %v384_v40 = vld [vmem:[%s1126_s4] ss:$4 sm:$0x3]  ;;  %vm585_vm8 = vcmask 7168   ;;  %vm592_vm9 = vcmask 15368  }
  0x11   : > { %v363_v2 = vld [vmem:[%s338_s7] sm:$0xff]  ;;  %s342_s13 = scalar_lea.vmem %s1125_s3, %s779_s28  ;;  %s777_s15 = sshll.u32 %s1140_s21, 1 }
  0x12   : > { %v993_v3 = vld [vmem:[%s334_s10] sm:$0xff]  ;;  %366 = vperm.xlu0 %849, %v363_v2   ;;  %s1010_s16 = sadd.s32 %s790_s14, %s777_s15  ;;  %s906_s28 = smov 17   ;;  %v1053_v42 = vand.u32 127, %v402_v37 }
  0x13   : > { %393 = vperm.xlu1 %850, %v993_v3   ;;  %416 = vperm.xlu2 %851, %v993_v3   ;;  %v371_v4 = vld [vmem:[%s342_s13] sm:$0xff]  ;;  %s778_s17 = sshll.u32 %s1010_s16, 2  ;;  %s910_s7 = smov 1  }
  0x14   : > { %s330_s20 = scalar_lea.vmem %s1122_s0, %s778_s17  ;;  %s915_s10 = smov 112   ;;  %v786_v41 = vld [vmem:[%s1126_s4 + $0x2] ss:$4 sm:$0x3]  ;;  %vm404_vm0 = vcmp.lt.s32.totalorder %v1053_v42, 17  ;;  %vm427_vm1 = vcmp.lt.s32.totalorder %v1053_v42, 16 }
  0x15   : > { %v360_v10 = vld [vmem:[%s330_s20] sm:$0xff]  ;;  %v407_v43 = vmul.f32 %v786_v41, %v384_v40  ;;  %v431_v53 = vperm.slane %v786_v41, 0  ;;  %v432_v54 = vperm.slane %v786_v41, 1  ;;  %vm449_vm2 = vcmp.lt.s32.totalorder %v1053_v42, 15 }
  0x16   : > { %v361_v11 = vunpack.c.l.bf16 %v360_v10  ;;  %v362_v12 = vunpack.c.h.bf16 %v360_v10  ;;  %v1059_v46 = vld [vmem:[%s1126_s4 + $0x1] ss:$4 sm:$0x3]  ;;  %v1066_v59 = vld [vmem:[%s1126_s4 + $0x3] ss:$4 sm:$0x3] }
  0x17   : > { %v409_v45 = vperm.slane %v407_v43, 0  ;;  %v410_v48 = vperm.slane %v407_v43, 1  ;;  %v452_v52 = vmul.f32 %v786_v41, %v1059_v46  ;;  %vm472_vm3 = vcmp.lt.s32.totalorder %v1053_v42, 1 }
  0x18   : > { %vm494_vm4 = vcmp.lt.s32.totalorder %v1053_v42, 127  ;;  %vm516_vm5 = vcmp.lt.s32.totalorder %v1053_v42, 113  ;;  %vm539_vm6 = vcmp.lt.s32.totalorder %v1053_v42, 112  ;;  %vm561_vm7 = vcmp.lt.s32.totalorder %v1053_v42, 111 }
  0x19   : > { %v454_v62 = vperm.slane %v452_v52, 0  ;;  %v455_v63 = vperm.slane %v452_v52, 1 }
  0x1a   : > { %374 = vperm.xlu0 %849, %v371_v4   ;;  %v476_v4 = vperm.slane %v384_v40, 0 }
  0x1b   : > { %852 = vset.pattern.permute.xlu1 %v902_v5  ;;  %858 = vset.pattern.permute.xlu2 %v911_v23  ;;  %v519_v5 = vmul.f32 %v1066_v59, %v384_v40 }
  0x1c   : > { %438 = vperm.xlu1 %852, %v993_v3  }
  0x22   : > { %859 = vset.pattern.permute.xlu0 %v911_v23 }
  0x24   : > { %853 = vset.pattern.permute.xlu1 %v903_v6 }
  0x25   : > { %461 = vperm.xlu1 %853, %v993_v3  }
  0x2d   : > { %854 = vset.pattern.permute.xlu1 %v904_v7 }
  0x2e   : > { %483 = vperm.xlu1 %854, %v993_v3  }
  0x36   : > { %855 = vset.pattern.permute.xlu1 %v905_v8 }
  0x37   : > { %505 = vperm.xlu1 %855, %v993_v3  }
  0x3f   : > { %856 = vset.pattern.permute.xlu1 %v908_v22 }
  0x6d   : > { %v417_v26 = vpop.permute.xlu2 %416 }
  0x84   : > { %v367_v9 = vpop.permute.xlu0 %366 }
  0x85   : > { %v369_v13 = vmul.f32 %v367_v9, %v361_v11  ;;  %v370_v14 = vmul.f32 %v367_v9, %v362_v12  ;;  %v394_v25 = vpop.permute.xlu1 %393  ;;  %v477_v9 = vperm.slane %v384_v40, 1  ;;  %v498_v11 = vperm.slane %v1059_v46, 0 }
  0x86   : > { %v499_v12 = vperm.slane %v1059_v46, 1 }
  0x8c   : > { %v375_v15 = vpop.permute.xlu0 %374 }
  0x8d   : > { %v377_v16 = vadd.f32 %v375_v15, %v369_v13  ;;  %v378_v17 = vadd.f32 %v375_v15, %v370_v14 }
  0x8e   : > { %v439_v27 = vpop.permute.xlu1 %438 }
  0x8f   : > { %v379_v18 = vmax.f32 %v377_v16, 0.0  ;;  %v380_v19 = vmax.f32 %v378_v17, 0.0 }
  0x91   : > { %v1018_v20 = vmin.f32 %v379_v18, 6.0  ;;  %v1020_v21 = vmin.f32 %v380_v19, 6.0 }
  0x93   : > { %400 = vrot.lane.b32.xlu2 %v1020_v21, %s906_s28  ;;  %423 = vrot.lane.b32.xlu0 %v1018_v20, %s907_s29  ;;  %v396_v60 = vmul.f32 %v394_v25, %v1018_v20  ;;  %v397_v61 = vmul.f32 %v394_v25, %v1020_v21 }
  0x94   : > { %398 = vrot.lane.b32.xlu1 %v1018_v20, %s906_s28 }
  0x97   : > { %v1041_v29 = vpop.permute.xlu1 %461 }
  0x9b   : > { %445 = vrot.lane.b32.xlu2 %v1018_v20, %s909_s30  ;;  %447 = vrot.lane.b32.xlu0 %v1020_v21, %s909_s30 }
  0x9c   : > { %425 = vrot.lane.b32.xlu1 %v1020_v21, %s907_s29 }
  0xa0   : > { %v1043_v31 = vpop.permute.xlu1 %483 }
  0xa3   : > { %468 = vrot.lane.b32.xlu2 %v1018_v20, %s910_s7  ;;  %470 = vrot.lane.b32.xlu0 %v1020_v21, %s910_s7  ;;  %s351_s7 = scalar_lea.vmem %s1127_s5, %s778_s17 }
  0xa4   : > { %528 = vperm.xlu1 %856, %v993_v3  }
  0xa9   : > { %v1045_v34 = vpop.permute.xlu1 %505 }
  0xab   : > { %490 = vrot.lane.b32.xlu2 %v1018_v20, %s912_s8  ;;  %492 = vrot.lane.b32.xlu0 %v1020_v21, %s912_s8  ;;  %s791_s8 = smul.u32 3, %s1142_s22 }
  0xac   : > { %857 = vset.pattern.permute.xlu1 %v913_v24 }
  0xad   : > { %550 = vperm.xlu1 %857, %v993_v3  }
  0xb3   : > { %512 = vrot.lane.b32.xlu2 %v1018_v20, %s914_s9  ;;  %514 = vrot.lane.b32.xlu0 %v1020_v21, %s914_s9  ;;  %s357_s9 = sadd.s32 %s791_s8, %s1140_s21 }
  0xbb   : > { %535 = vrot.lane.b32.xlu2 %v1018_v20, %s915_s10  ;;  %537 = vrot.lane.b32.xlu0 %v1020_v21, %s915_s10  ;;  %s784_s10 = sshll.u32 %s357_s9, 3 }
  0xbc   : > { %s359_s13 = scalar_lea.vmem %s1128_s6, %s784_s10 }
  0xc3   : > { %557 = vrot.lane.b32.xlu2 %v1018_v20, %s916_s11  ;;  %559 = vrot.lane.b32.xlu0 %v1020_v21, %s916_s11  ;;  %v521_v20 = vperm.slane %v519_v5, 0  ;;  %v522_v21 = vperm.slane %v519_v5, 1 }
  0xcb   : > { %573 = vperm.xlu2 %858, %v993_v3  }
  0xed   : > { %v401_v28 = vpop.permute.xlu2 %400 }
  0xf5   : > { %v446_v30 = vpop.permute.xlu2 %445 }
  0xfd   : > { %v469_v33 = vpop.permute.xlu2 %468 }
 0x105   : > { %v424_v32 = vpop.permute.xlu0 %423  ;;  %v491_v36 = vpop.permute.xlu2 %490 }
 0x106   : > { %v399_v38 = vpop.permute.xlu1 %398 }
 0x107   : > { %v406_v49 = vsel %vm404_vm0, %v401_v28, %v399_v38  ;;  %v405_v51 = vsel %vm404_vm0, %v399_v38, %v401_v28 }
 0x108   : > { %v413_v55 = vmul.f32 %v409_v45, %v406_v49  ;;  %v414_v58 = vmul.f32 %v410_v48, %v405_v51  ;;  %v564_v48 = vmul.f32 %v1066_v59, %v1059_v46 }
 0x10a   : > { %v419_v3 = vmul.f32 %v417_v26, %v413_v55  ;;  %v420_v7 = vmul.f32 %v417_v26, %v414_v58  ;;  %v566_v58 = vperm.slane %v564_v48, 0 }
 0x10c   : > { %v421_v18 = vadd.f32 %v419_v3, %v396_v60  ;;  %v422_v22 = vadd.f32 %v420_v7, %v397_v61  ;;  %v567_v60 = vperm.slane %v564_v48, 1 }
 0x10d   : > { %v448_v35 = vpop.permute.xlu0 %447  ;;  %v513_v44 = vpop.permute.xlu2 %512 }
 0x10e   : > { %v426_v50 = vpop.permute.xlu1 %425  ;;  %v451_v8 = vsel %vm449_vm2, %v448_v35, %v446_v30  ;;  %v450_v10 = vsel %vm449_vm2, %v446_v30, %v448_v35 }
 0x10f   : > { %v428_v56 = vsel %vm427_vm1, %v424_v32, %v426_v50  ;;  %v429_v57 = vsel %vm427_vm1, %v426_v50, %v424_v32  ;;  %v458_v19 = vmul.f32 %v454_v62, %v451_v8  ;;  %v459_v23 = vmul.f32 %v455_v63, %v450_v10 }
 0x110   : > { %v435_v0 = vmul.f32 %v431_v53, %v429_v57  ;;  %v436_v1 = vmul.f32 %v432_v54, %v428_v56 }
 0x111   : > { %v464_v37 = vmul.f32 %v1041_v29, %v458_v19  ;;  %v465_v41 = vmul.f32 %v1041_v29, %v459_v23 }
 0x112   : > { %v441_v13 = vmul.f32 %v439_v27, %v435_v0  ;;  %v442_v14 = vmul.f32 %v439_v27, %v436_v1  ;;  %v543_v27 = vperm.slane %v1066_v59, 0 }
 0x114   : > { %v443_v30 = vadd.f32 %v441_v13, %v421_v18  ;;  %v444_v32 = vadd.f32 %v442_v14, %v422_v22 }
 0x115   : > { %v471_v39 = vpop.permute.xlu0 %470  ;;  %v536_v2 = vpop.permute.xlu2 %535 }
 0x116   : > { %v473_v15 = vsel %vm472_vm3, %v469_v33, %v471_v39  ;;  %v474_v16 = vsel %vm472_vm3, %v471_v39, %v469_v33  ;;  %v529_v17 = vpop.permute.xlu1 %528  ;;  %v466_v52 = vadd.f32 %v464_v37, %v443_v30  ;;  %v467_v53 = vadd.f32 %v465_v41, %v444_v32 }
 0x117   : > { %v480_v26 = vmul.f32 %v476_v4, %v474_v16  ;;  %v481_v28 = vmul.f32 %v477_v9, %v473_v15 }
 0x119   : > { %v486_v49 = vmul.f32 %v1043_v31, %v480_v26  ;;  %v487_v50 = vmul.f32 %v1043_v31, %v481_v28 }
 0x11b   : > { %v488_v46 = vadd.f32 %v486_v49, %v466_v52 }
 0x11d   : > { %v493_v47 = vpop.permute.xlu0 %492  ;;  %v558_v43 = vpop.permute.xlu2 %557 }
 0x11e   : > { %v495_v24 = vsel %vm494_vm4, %v491_v36, %v493_v47  ;;  %v496_v25 = vsel %vm494_vm4, %v493_v47, %v491_v36  ;;  %v544_v36 = vperm.slane %v1066_v59, 1  ;;  %v489_v59 = vadd.f32 %v487_v50, %v467_v53 }
 0x11f   : > { %v502_v38 = vmul.f32 %v498_v11, %v495_v24  ;;  %v503_v39 = vmul.f32 %v499_v12, %v496_v25  ;;  %v551_v57 = vpop.permute.xlu1 %550 }
 0x121   : > { %v508_v54 = vmul.f32 %v1045_v34, %v502_v38  ;;  %v509_v55 = vmul.f32 %v1045_v34, %v503_v39 }
 0x123   : > { %v511_v31 = vadd.f32 %v509_v55, %v489_v59  ;;  %v510_v63 = vadd.f32 %v508_v54, %v488_v46 }
 0x125   : > { %v515_v6 = vpop.permute.xlu0 %514  ;;  %v574_v34 = vpop.permute.xlu2 %573 }
 0x126   : > { %v517_v33 = vsel %vm516_vm5, %v513_v44, %v515_v6  ;;  %v518_v35 = vsel %vm516_vm5, %v515_v6, %v513_v44 }
 0x127   : > { %v525_v44 = vmul.f32 %v521_v20, %v517_v33  ;;  %v526_v51 = vmul.f32 %v522_v21, %v518_v35 }
 0x129   : > { %v531_v61 = vmul.f32 %v529_v17, %v525_v44  ;;  %v532_v62 = vmul.f32 %v529_v17, %v526_v51 }
 0x12b   : > { %v533_v5 = vadd.f32 %v531_v61, %v510_v63  ;;  %v534_v6 = vadd.f32 %v532_v62, %v511_v31 }
 0x12d   : > { %v538_v40 = vpop.permute.xlu0 %537 }
 0x12e   : > { %v540_v45 = vsel %vm539_vm6, %v536_v2, %v538_v40  ;;  %v541_v47 = vsel %vm539_vm6, %v538_v40, %v536_v2 }
 0x12f   : > { %v547_v56 = vmul.f32 %v543_v27, %v540_v45  ;;  %v548_v29 = vmul.f32 %v544_v36, %v541_v47 }
 0x131   : > { %v553_v0 = vmul.f32 %v551_v57, %v547_v56  ;;  %v554_v1 = vmul.f32 %v551_v57, %v548_v29 }
 0x133   : > { %v555_v42 = vadd.f32 %v553_v0, %v533_v5  ;;  %v556_v9 = vadd.f32 %v554_v1, %v534_v6 }
 0x135   : > { %v560_v2 = vpop.permute.xlu0 %559 }
 0x136   : > { %v562_v3 = vsel %vm561_vm7, %v558_v43, %v560_v2  ;;  %v563_v4 = vsel %vm561_vm7, %v560_v2, %v558_v43 }
 0x137   : > { %v570_v7 = vmul.f32 %v566_v58, %v562_v3  ;;  %v571_v8 = vmul.f32 %v567_v60, %v563_v4 }
 0x139   : > { %v576_v10 = vmul.f32 %v574_v34, %v570_v7  ;;  %v577_v11 = vmul.f32 %v574_v34, %v571_v8 }
 0x13b   : > { %v578_v12 = vadd.f32 %v576_v10, %v555_v42  ;;  %v579_v13 = vadd.f32 %v577_v11, %v556_v9 }
 0x13d   : > { %v580_v14 = vpack.c.bf16 %v579_v13, %v578_v12  ;;  %v582_v15 = vadd.f32 %v579_v13, %v578_v12  ;;  %v587_v16 = vmul.f32 %v578_v12, %v578_v12  ;;  %v588_v17 = vmul.f32 %v579_v13, %v579_v13 }
 0x13f   : > { %581 = vst [vmem:[%s351_s7] sm:$0xff] %v580_v14  ;;  %583 = vadd.xlane.f32.xlu0 %v582_v15  ;;  %v589_v18 = vadd.f32 %v588_v17, %v587_v16 }
 0x141   : > { %590 = vadd.xlane.f32.xlu1 %v589_v18 }
 0x1b2   : > { %v584_v19 = vpop.xlane.xlu0 %583 }
 0x1b3   : > { %586 = vst.msk [vmem:[%s359_s13] sm:$0xff] %vm585_vm8, %v584_v19 }
 0x1b4   : > { %v591_v20 = vpop.xlane.xlu1 %590 }
 0x1b5   : > { %593 = vst.msk [vmem:[%s359_s13] sm:$0xff] %vm592_vm9, %v591_v20 }
 0x1b6 PF: > { %s17_s25 = sadd.s32 1, %s898_s25   ;;  %s1129_s21 = smov %s890_s23 }
 0x1b7   : > { %p14_p7 = scmp.ge.s32.totalorder %s17_s25, 8   ;;  %s1130_s22 = smov %s894_s24 }
 0x1b8   : > { %s1131_s23 = smov %s1134_s26  ;;  %s1132_s24 = smov %s1138_s27 }
 0x1b9   :  { %16 = sbr.rel (!%p14_p7) target bundleno = 3 (0x3), region = 94 }

</bundles_post_ra>
